<compile_context>
chip_gen: v5e
topology: v5e:2x2
jax: 0.10.0
libtpu: 0.0.40
codegen_flags: <defaults>
</compile_context>

<pallas_src>
import functools

import jax
import jax.numpy as jnp
from jax.experimental import pallas as pl
from jax.experimental.pallas import tpu as pltpu


_CHUNK = 32      # unrolled steps between res stores (lane-slab store width)
_MAX_TILE = 128  # lanes of x/res per pipelined grid step (multiple of 128)


def _round_up(a, b):
    return (a + b - 1) // b * b


# Params live in SMEM as a flat (8,) f32 vector:
#   [w_ih_l0, w_hh_l0, b_ih_l0, b_hh_l0, w_ih_l1, w_hh_l1, b_ih_l1, b_hh_l1]
def _rnn2_kernel(params_ref, x_ref, res_ref, hT_ref, h_scr,
                 *, tile, n_tiles, t_last):
    """One grid step processes `tile` timesteps (lanes) for all batch rows.

    x_ref/res_ref: (B, tile) blocks, batch on sublanes, time on lanes.
    hT_ref: (B, 2) resident output block, written once at the last valid step.
    h_scr: (B, 2) persistent VMEM carry: column 0 = h0, column 1 = h1.
    """
    B = x_ref.shape[0]
    g = pl.program_id(0)

    @pl.when(g == 0)
    def _init():
        h_scr[...] = jnp.zeros_like(h_scr)

    p = params_ref
    # Hoist scalar -> vector broadcasts out of the loops (JAX does not CSE them).
    w_hh0 = jnp.full((B, 1), p[1], jnp.float32)
    w_ih1 = jnp.full((B, 1), p[4], jnp.float32)
    w_hh1 = jnp.full((B, 1), p[5], jnp.float32)
    b1 = jnp.full((B, 1), p[6] + p[7], jnp.float32)

    # Layer-0 input term for the whole tile in one slab op (VPU filler).
    pre0 = x_ref[...] * p[0] + (p[2] + p[3])           # (B, tile)

    h0 = h_scr[:, 0:1]                                  # h0[t0-1]  (t0 = g*tile)
    h1 = h_scr[:, 1:2]                                  # h1[t0-1]

    def latch(h0_t, h1_t):
        # Final hidden state: written once, at the last valid global timestep
        # (always inside the last tile because of the padding policy).
        @pl.when(g == n_tiles - 1)
        def _():
            hT_ref[...] = jnp.concatenate([h0_t, h1_t], axis=1)

    # Tile head: h0[t0] alone (its layer-1 partner belonged to the previous tile).
    h0 = jnp.tanh(pre0[:, 0:1] + w_hh0 * h0)

    for c in range(tile // _CHUNK):
        t0 = c * _CHUNK
        cols = []
        for j in range(_CHUNK):
            t = t0 + j                     # in-tile index of the h1 produced now
            if t < tile - 1:
                # Skewed fused step: h0[t+1] and h1[t] share ONE vector tanh.
                pre_top = pre0[:, t + 1:t + 2] + w_hh0 * h0          # -> h0[t+1]
                pre_bot = w_ih1 * h0 + b1 + w_hh1 * h1               # -> h1[t]
                both = jnp.tanh(jnp.concatenate([pre_top, pre_bot], axis=1))
                h0_t = h0                   # h0[t], pairs with h1[t] below
                h0 = both[:, 0:1]           # h0[t+1]
                h1 = both[:, 1:2]           # h1[t]
            else:
                # Tile tail: only h1[tile-1]; h0 already holds h0[tile-1].
                h0_t = h0
                h1 = jnp.tanh(w_ih1 * h0 + b1 + w_hh1 * h1)
            cols.append(h1)
            if t == t_last:                 # static trace-time check
                latch(h0_t, h1)
        # One lane-dense (B, CHUNK) store per chunk.
        res_ref[:, t0:t0 + _CHUNK] = jnp.concatenate(cols, axis=1)

    # Carry (h0[tile-1], h1[tile-1]) to the next grid step.
    h_scr[...] = jnp.concatenate([h0, h1], axis=1)


def my_balls_forward(x, params):
    """x: (B, T, 1) float32 (batch_first). Returns (res, h) like the torch module."""
    B, T, _ = x.shape
    x_bt = x[..., 0].astype(jnp.float32)                # (B, T): no transpose

    if T <= _MAX_TILE:
        tile = _round_up(T, _CHUNK)                     # single grid step
    else:
        tile = _MAX_TILE                                # multiple of 128 lanes
    t_pad = _round_up(T, tile)
    n_tiles = t_pad // tile
    if t_pad != T:
        # Zero-pad time; padded steps compute finite garbage that is sliced off,
        # and the final hidden state is latched at t = T-1 inside the kernel.
        x_bt = jnp.pad(x_bt, ((0, 0), (0, t_pad - T)))

    kernel = functools.partial(
        _rnn2_kernel, tile=tile, n_tiles=n_tiles,
        t_last=(T - 1) - (n_tiles - 1) * tile)

    res_bt, hT = pl.pallas_call(
        kernel,
        grid=(n_tiles,),
        out_shape=(
            jax.ShapeDtypeStruct((B, t_pad), jnp.float32),
            jax.ShapeDtypeStruct((B, 2), jnp.float32),
        ),
        in_specs=[
            pl.BlockSpec(memory_space=pltpu.MemorySpace.SMEM),   # params (8,)
            pl.BlockSpec((B, tile), lambda g: (0, g)),           # x tile (pipelined)
        ],
        out_specs=(
            pl.BlockSpec((B, tile), lambda g: (0, g)),           # res tile
            pl.BlockSpec((B, 2), lambda g: (0, 0)),              # final hidden (resident)
        ),
        scratch_shapes=[pltpu.VMEM((B, 2), jnp.float32)],        # (h0, h1) carry
        compiler_params=pltpu.CompilerParams(
            dimension_semantics=("arbitrary",)),                 # serial over T
    )(params, x_bt)

    res = res_bt[:, :T, None]                                    # (B, T, 1)
    h = jnp.transpose(hT, (1, 0))[..., None]                     # (2, B, 1) (tiny)
    return res, h


def _reference_forward(x, params):
    """Pure-JAX reference of the same 2-layer tanh RNN recurrence."""
    B, T, _ = x.shape
    w_ih0, w_hh0, b_ih0, b_hh0, w_ih1, w_hh1, b_ih1, b_hh1 = [params[i] for i in range(8)]
    h0 = jnp.zeros((B,), jnp.float32)
    h1 = jnp.zeros((B,), jnp.float32)
    outs = []
    for t in range(T):
        x_t = x[:, t, 0]
        h0 = jnp.tanh(w_ih0 * x_t + b_ih0 + w_hh0 * h0 + b_hh0)
        h1 = jnp.tanh(w_ih1 * h0 + b_ih1 + w_hh1 * h1 + b_hh1)
        outs.append(h1)
    res = jnp.stack(outs, axis=1)[..., None]                     # (B, T, 1)
    h = jnp.stack([h0, h1], axis=0)[..., None]                   # (2, B, 1)
    return res, h


if __name__ == "__main__":
    key = jax.random.PRNGKey(0)
    kp, k1, k2, k3 = jax.random.split(key, 4)

    # nn.RNN default init is U(-1/sqrt(H), 1/sqrt(H)); H = 1 -> (-1, 1).
    params = jax.random.uniform(kp, (8,), jnp.float32, -1.0, 1.0)

    fwd = jax.jit(my_balls_forward)

    # (B, T): primary small case; non-multiple-of-chunk case; multi-tile case
    # exercising the pipelined T grid, padding and the final-hidden latch.
    for (B, T), kx in (((2, 8), k1), ((2, 45), k2), ((3, 200), k3)):
        x = jax.random.normal(kx, (B, T, 1), jnp.float32)
        res, h = fwd(x, params)
        jax.block_until_ready((res, h))
        res_ref, h_ref = _reference_forward(x, params)
        assert res.shape == (B, T, 1) and h.shape == (2, B, 1)
        assert jnp.allclose(res, res_ref, atol=1e-5, rtol=1e-5), ("res mismatch", B, T)
        assert jnp.allclose(h, h_ref, atol=1e-5, rtol=1e-5), ("h mismatch", B, T)

    print("KERNEL_OK")
</pallas_src>

<mosaic_0001>
module attributes {stable_mosaic.version = 11 : i64} {
  func.func @_rnn2_kernel(%arg0: i32, %arg1: memref<8xf32, #tpu.memory_space<smem>>, %arg2: memref<2x32xf32, #tpu.memory_space<vmem>>, %arg3: memref<2x32xf32, #tpu.memory_space<vmem>>, %arg4: memref<2x2xf32, #tpu.memory_space<vmem>>, %arg5: memref<2x2xf32, #tpu.memory_space<vmem>>) attributes {dimension_semantics = [#tpu.dimension_semantics<arbitrary>], iteration_bounds = array<i64: 1>, scalar_prefetch = 0 : i64, scratch_operands = 1 : i64, tpu.core_type = #tpu.core_type<tc>, window_params = [{transform_indices = @transform_0, window_bounds = array<i64: 8>}, {transform_indices = @transform_1, window_bounds = array<i64: 2, 32>}, {transform_indices = @transform_2, window_bounds = array<i64: 2, 32>}, {pipeline_mode = #tpu.pipeline_mode<synchronous>, transform_indices = @transform_3, window_bounds = array<i64: 2, 2>}]} {
    %c0_i32 = arith.constant 0 : i32
    %0 = arith.cmpi eq, %arg0, %c0_i32 : i32
    %1 = arith.extui %0 : i1 to i32
    %c0_i32_0 = arith.constant 0 : i32
    %2 = arith.cmpi ne, %1, %c0_i32_0 : i32
    scf.if %2 {
      %cst = arith.constant 0.000000e+00 : f32
      %383 = vector.broadcast %cst : f32 to vector<2x2xf32>
      %c0_13 = arith.constant 0 : index
      %c0_14 = arith.constant 0 : index
      %384 = vector.load %arg5[%c0_13, %c0_14] : memref<2x2xf32, #tpu.memory_space<vmem>>, vector<2x2xf32>
      tpu.vector_store %arg5[%c0_13, %c0_14], %383 {strides = array<i32>} : memref<2x2xf32, #tpu.memory_space<vmem>>, vector<2x2xf32>,
    } else {
    }
    %c1 = arith.constant 1 : index
    %3 = memref.load %arg1[%c1] : memref<8xf32, #tpu.memory_space<smem>>
    %4 = vector.broadcast %3 : f32 to vector<2x1xf32>
    %c4 = arith.constant 4 : index
    %5 = memref.load %arg1[%c4] : memref<8xf32, #tpu.memory_space<smem>>
    %6 = vector.broadcast %5 : f32 to vector<2x1xf32>
    %c5 = arith.constant 5 : index
    %7 = memref.load %arg1[%c5] : memref<8xf32, #tpu.memory_space<smem>>
    %8 = vector.broadcast %7 : f32 to vector<2x1xf32>
    %c6 = arith.constant 6 : index
    %9 = memref.load %arg1[%c6] : memref<8xf32, #tpu.memory_space<smem>>
    %c7 = arith.constant 7 : index
    %10 = memref.load %arg1[%c7] : memref<8xf32, #tpu.memory_space<smem>>
    %11 = arith.addf %9, %10 : f32
    %12 = vector.broadcast %11 : f32 to vector<2x1xf32>
    %c0 = arith.constant 0 : index
    %c0_1 = arith.constant 0 : index
    %13 = vector.load %arg2[%c0, %c0_1] : memref<2x32xf32, #tpu.memory_space<vmem>>, vector<2x32xf32>
    %c0_2 = arith.constant 0 : index
    %14 = memref.load %arg1[%c0_2] : memref<8xf32, #tpu.memory_space<smem>>
    %15 = vector.broadcast %14 : f32 to vector<2x32xf32>
    %16 = arith.mulf %13, %15 : vector<2x32xf32>
    %c2 = arith.constant 2 : index
    %17 = memref.load %arg1[%c2] : memref<8xf32, #tpu.memory_space<smem>>
    %c3 = arith.constant 3 : index
    %18 = memref.load %arg1[%c3] : memref<8xf32, #tpu.memory_space<smem>>
    %19 = arith.addf %17, %18 : f32
    %20 = vector.broadcast %19 : f32 to vector<2x32xf32>
    %21 = arith.addf %16, %20 : vector<2x32xf32>
    %c0_3 = arith.constant 0 : index
    %c0_4 = arith.constant 0 : index
    %22 = vector.load %arg5[%c0_3, %c0_4] : memref<2x2xf32, #tpu.memory_space<vmem>>, vector<2x1xf32>
    %c0_5 = arith.constant 0 : index
    %c1_6 = arith.constant 1 : index
    %23 = vector.load %arg5[%c0_5, %c1_6] : memref<2x2xf32, #tpu.memory_space<vmem>>, vector<2x1xf32>
    %24 = vector.extract_strided_slice %21 {offsets = [0, 0], sizes = [2, 1], strides = [1, 1]} : vector<2x32xf32> to vector<2x1xf32>
    %25 = arith.mulf %4, %22 : vector<2x1xf32>
    %26 = arith.addf %24, %25 : vector<2x1xf32>
    %27 = math.tanh %26 : vector<2x1xf32>
    %28 = vector.extract_strided_slice %21 {offsets = [0, 1], sizes = [2, 1], strides = [1, 1]} : vector<2x32xf32> to vector<2x1xf32>
    %29 = arith.mulf %4, %27 : vector<2x1xf32>
    %30 = arith.addf %28, %29 : vector<2x1xf32>
    %31 = arith.mulf %6, %27 : vector<2x1xf32>
    %32 = arith.addf %31, %12 : vector<2x1xf32>
    %33 = arith.mulf %8, %23 : vector<2x1xf32>
    %34 = arith.addf %32, %33 : vector<2x1xf32>
    %35 = tpu.concatenate %30, %34 in 1 : vector<2x1xf32>, vector<2x1xf32> -> vector<2x2xf32>
    %36 = math.tanh %35 : vector<2x2xf32>
    %37 = vector.extract_strided_slice %36 {offsets = [0, 0], sizes = [2, 1], strides = [1, 1]} : vector<2x2xf32> to vector<2x1xf32>
    %38 = vector.extract_strided_slice %36 {offsets = [0, 1], sizes = [2, 1], strides = [1, 1]} : vector<2x2xf32> to vector<2x1xf32>
    %39 = vector.extract_strided_slice %21 {offsets = [0, 2], sizes = [2, 1], strides = [1, 1]} : vector<2x32xf32> to vector<2x1xf32>
    %40 = arith.mulf %4, %37 : vector<2x1xf32>
    %41 = arith.addf %39, %40 : vector<2x1xf32>
    %42 = arith.mulf %6, %37 : vector<2x1xf32>
    %43 = arith.addf %42, %12 : vector<2x1xf32>
    %44 = arith.mulf %8, %38 : vector<2x1xf32>
    %45 = arith.addf %43, %44 : vector<2x1xf32>
    %46 = tpu.concatenate %41, %45 in 1 : vector<2x1xf32>, vector<2x1xf32> -> vector<2x2xf32>
    %47 = math.tanh %46 : vector<2x2xf32>
    %48 = vector.extract_strided_slice %47 {offsets = [0, 0], sizes = [2, 1], strides = [1, 1]} : vector<2x2xf32> to vector<2x1xf32>
    %49 = vector.extract_strided_slice %47 {offsets = [0, 1], sizes = [2, 1], strides = [1, 1]} : vector<2x2xf32> to vector<2x1xf32>
    %50 = vector.extract_strided_slice %21 {offsets = [0, 3], sizes = [2, 1], strides = [1, 1]} : vector<2x32xf32> to vector<2x1xf32>
    %51 = arith.mulf %4, %48 : vector<2x1xf32>
    %52 = arith.addf %50, %51 : vector<2x1xf32>
    %53 = arith.mulf %6, %48 : vector<2x1xf32>
    %54 = arith.addf %53, %12 : vector<2x1xf32>
    %55 = arith.mulf %8, %49 : vector<2x1xf32>
    %56 = arith.addf %54, %55 : vector<2x1xf32>
    %57 = tpu.concatenate %52, %56 in 1 : vector<2x1xf32>, vector<2x1xf32> -> vector<2x2xf32>
    %58 = math.tanh %57 : vector<2x2xf32>
    %59 = vector.extract_strided_slice %58 {offsets = [0, 0], sizes = [2, 1], strides = [1, 1]} : vector<2x2xf32> to vector<2x1xf32>
    %60 = vector.extract_strided_slice %58 {offsets = [0, 1], sizes = [2, 1], strides = [1, 1]} : vector<2x2xf32> to vector<2x1xf32>
    %61 = vector.extract_strided_slice %21 {offsets = [0, 4], sizes = [2, 1], strides = [1, 1]} : vector<2x32xf32> to vector<2x1xf32>
    %62 = arith.mulf %4, %59 : vector<2x1xf32>
    %63 = arith.addf %61, %62 : vector<2x1xf32>
    %64 = arith.mulf %6, %59 : vector<2x1xf32>
    %65 = arith.addf %64, %12 : vector<2x1xf32>
    %66 = arith.mulf %8, %60 : vector<2x1xf32>
    %67 = arith.addf %65, %66 : vector<2x1xf32>
    %68 = tpu.concatenate %63, %67 in 1 : vector<2x1xf32>, vector<2x1xf32> -> vector<2x2xf32>
    %69 = math.tanh %68 : vector<2x2xf32>
    %70 = vector.extract_strided_slice %69 {offsets = [0, 0], sizes = [2, 1], strides = [1, 1]} : vector<2x2xf32> to vector<2x1xf32>
    %71 = vector.extract_strided_slice %69 {offsets = [0, 1], sizes = [2, 1], strides = [1, 1]} : vector<2x2xf32> to vector<2x1xf32>
    %72 = vector.extract_strided_slice %21 {offsets = [0, 5], sizes = [2, 1], strides = [1, 1]} : vector<2x32xf32> to vector<2x1xf32>
    %73 = arith.mulf %4, %70 : vector<2x1xf32>
    %74 = arith.addf %72, %73 : vector<2x1xf32>
    %75 = arith.mulf %6, %70 : vector<2x1xf32>
    %76 = arith.addf %75, %12 : vector<2x1xf32>
    %77 = arith.mulf %8, %71 : vector<2x1xf32>
    %78 = arith.addf %76, %77 : vector<2x1xf32>
    %79 = tpu.concatenate %74, %78 in 1 : vector<2x1xf32>, vector<2x1xf32> -> vector<2x2xf32>
    %80 = math.tanh %79 : vector<2x2xf32>
    %81 = vector.extract_strided_slice %80 {offsets = [0, 0], sizes = [2, 1], strides = [1, 1]} : vector<2x2xf32> to vector<2x1xf32>
    %82 = vector.extract_strided_slice %80 {offsets = [0, 1], sizes = [2, 1], strides = [1, 1]} : vector<2x2xf32> to vector<2x1xf32>
    %83 = vector.extract_strided_slice %21 {offsets = [0, 6], sizes = [2, 1], strides = [1, 1]} : vector<2x32xf32> to vector<2x1xf32>
    %84 = arith.mulf %4, %81 : vector<2x1xf32>
    %85 = arith.addf %83, %84 : vector<2x1xf32>
    %86 = arith.mulf %6, %81 : vector<2x1xf32>
    %87 = arith.addf %86, %12 : vector<2x1xf32>
    %88 = arith.mulf %8, %82 : vector<2x1xf32>
    %89 = arith.addf %87, %88 : vector<2x1xf32>
    %90 = tpu.concatenate %85, %89 in 1 : vector<2x1xf32>, vector<2x1xf32> -> vector<2x2xf32>
    %91 = math.tanh %90 : vector<2x2xf32>
    %92 = vector.extract_strided_slice %91 {offsets = [0, 0], sizes = [2, 1], strides = [1, 1]} : vector<2x2xf32> to vector<2x1xf32>
    %93 = vector.extract_strided_slice %91 {offsets = [0, 1], sizes = [2, 1], strides = [1, 1]} : vector<2x2xf32> to vector<2x1xf32>
    %94 = vector.extract_strided_slice %21 {offsets = [0, 7], sizes = [2, 1], strides = [1, 1]} : vector<2x32xf32> to vector<2x1xf32>
    %95 = arith.mulf %4, %92 : vector<2x1xf32>
    %96 = arith.addf %94, %95 : vector<2x1xf32>
    %97 = arith.mulf %6, %92 : vector<2x1xf32>
    %98 = arith.addf %97, %12 : vector<2x1xf32>
    %99 = arith.mulf %8, %93 : vector<2x1xf32>
    %100 = arith.addf %98, %99 : vector<2x1xf32>
    %101 = tpu.concatenate %96, %100 in 1 : vector<2x1xf32>, vector<2x1xf32> -> vector<2x2xf32>
    %102 = math.tanh %101 : vector<2x2xf32>
    %103 = vector.extract_strided_slice %102 {offsets = [0, 0], sizes = [2, 1], strides = [1, 1]} : vector<2x2xf32> to vector<2x1xf32>
    %104 = vector.extract_strided_slice %102 {offsets = [0, 1], sizes = [2, 1], strides = [1, 1]} : vector<2x2xf32> to vector<2x1xf32>
    %105 = vector.extract_strided_slice %21 {offsets = [0, 8], sizes = [2, 1], strides = [1, 1]} : vector<2x32xf32> to vector<2x1xf32>
    %106 = arith.mulf %4, %103 : vector<2x1xf32>
    %107 = arith.addf %105, %106 : vector<2x1xf32>
    %108 = arith.mulf %6, %103 : vector<2x1xf32>
    %109 = arith.addf %108, %12 : vector<2x1xf32>
    %110 = arith.mulf %8, %104 : vector<2x1xf32>
    %111 = arith.addf %109, %110 : vector<2x1xf32>
    %112 = tpu.concatenate %107, %111 in 1 : vector<2x1xf32>, vector<2x1xf32> -> vector<2x2xf32>
    %113 = math.tanh %112 : vector<2x2xf32>
    %114 = vector.extract_strided_slice %113 {offsets = [0, 0], sizes = [2, 1], strides = [1, 1]} : vector<2x2xf32> to vector<2x1xf32>
    %115 = vector.extract_strided_slice %113 {offsets = [0, 1], sizes = [2, 1], strides = [1, 1]} : vector<2x2xf32> to vector<2x1xf32>
    %c0_i32_7 = arith.constant 0 : i32
    %116 = arith.cmpi eq, %arg0, %c0_i32_7 : i32
    %117 = arith.extui %116 : i1 to i32
    %c0_i32_8 = arith.constant 0 : i32
    %118 = arith.cmpi ne, %117, %c0_i32_8 : i32
    scf.if %118 {
      %383 = tpu.concatenate %103, %115 in 1 : vector<2x1xf32>, vector<2x1xf32> -> vector<2x2xf32>
      %c0_13 = arith.constant 0 : index
      %c0_14 = arith.constant 0 : index
      %384 = vector.load %arg4[%c0_13, %c0_14] : memref<2x2xf32, #tpu.memory_space<vmem>>, vector<2x2xf32>
      tpu.vector_store %arg4[%c0_13, %c0_14], %383 {strides = array<i32>} : memref<2x2xf32, #tpu.memory_space<vmem>>, vector<2x2xf32>,
    } else {
    }
    %119 = vector.extract_strided_slice %21 {offsets = [0, 9], sizes = [2, 1], strides = [1, 1]} : vector<2x32xf32> to vector<2x1xf32>
    %120 = arith.mulf %4, %114 : vector<2x1xf32>
    %121 = arith.addf %119, %120 : vector<2x1xf32>
    %122 = arith.mulf %6, %114 : vector<2x1xf32>
    %123 = arith.addf %122, %12 : vector<2x1xf32>
    %124 = arith.mulf %8, %115 : vector<2x1xf32>
    %125 = arith.addf %123, %124 : vector<2x1xf32>
    %126 = tpu.concatenate %121, %125 in 1 : vector<2x1xf32>, vector<2x1xf32> -> vector<2x2xf32>
    %127 = math.tanh %126 : vector<2x2xf32>
    %128 = vector.extract_strided_slice %127 {offsets = [0, 0], sizes = [2, 1], strides = [1, 1]} : vector<2x2xf32> to vector<2x1xf32>
    %129 = vector.extract_strided_slice %127 {offsets = [0, 1], sizes = [2, 1], strides = [1, 1]} : vector<2x2xf32> to vector<2x1xf32>
    %130 = vector.extract_strided_slice %21 {offsets = [0, 10], sizes = [2, 1], strides = [1, 1]} : vector<2x32xf32> to vector<2x1xf32>
    %131 = arith.mulf %4, %128 : vector<2x1xf32>
    %132 = arith.addf %130, %131 : vector<2x1xf32>
    %133 = arith.mulf %6, %128 : vector<2x1xf32>
    %134 = arith.addf %133, %12 : vector<2x1xf32>
    %135 = arith.mulf %8, %129 : vector<2x1xf32>
    %136 = arith.addf %134, %135 : vector<2x1xf32>
    %137 = tpu.concatenate %132, %136 in 1 : vector<2x1xf32>, vector<2x1xf32> -> vector<2x2xf32>
    %138 = math.tanh %137 : vector<2x2xf32>
    %139 = vector.extract_strided_slice %138 {offsets = [0, 0], sizes = [2, 1], strides = [1, 1]} : vector<2x2xf32> to vector<2x1xf32>
    %140 = vector.extract_strided_slice %138 {offsets = [0, 1], sizes = [2, 1], strides = [1, 1]} : vector<2x2xf32> to vector<2x1xf32>
    %141 = vector.extract_strided_slice %21 {offsets = [0, 11], sizes = [2, 1], strides = [1, 1]} : vector<2x32xf32> to vector<2x1xf32>
    %142 = arith.mulf %4, %139 : vector<2x1xf32>
    %143 = arith.addf %141, %142 : vector<2x1xf32>
    %144 = arith.mulf %6, %139 : vector<2x1xf32>
    %145 = arith.addf %144, %12 : vector<2x1xf32>
    %146 = arith.mulf %8, %140 : vector<2x1xf32>
    %147 = arith.addf %145, %146 : vector<2x1xf32>
    %148 = tpu.concatenate %143, %147 in 1 : vector<2x1xf32>, vector<2x1xf32> -> vector<2x2xf32>
    %149 = math.tanh %148 : vector<2x2xf32>
    %150 = vector.extract_strided_slice %149 {offsets = [0, 0], sizes = [2, 1], strides = [1, 1]} : vector<2x2xf32> to vector<2x1xf32>
    %151 = vector.extract_strided_slice %149 {offsets = [0, 1], sizes = [2, 1], strides = [1, 1]} : vector<2x2xf32> to vector<2x1xf32>
    %152 = vector.extract_strided_slice %21 {offsets = [0, 12], sizes = [2, 1], strides = [1, 1]} : vector<2x32xf32> to vector<2x1xf32>
    %153 = arith.mulf %4, %150 : vector<2x1xf32>
    %154 = arith.addf %152, %153 : vector<2x1xf32>
    %155 = arith.mulf %6, %150 : vector<2x1xf32>
    %156 = arith.addf %155, %12 : vector<2x1xf32>
    %157 = arith.mulf %8, %151 : vector<2x1xf32>
    %158 = arith.addf %156, %157 : vector<2x1xf32>
    %159 = tpu.concatenate %154, %158 in 1 : vector<2x1xf32>, vector<2x1xf32> -> vector<2x2xf32>
    %160 = math.tanh %159 : vector<2x2xf32>
    %161 = vector.extract_strided_slice %160 {offsets = [0, 0], sizes = [2, 1], strides = [1, 1]} : vector<2x2xf32> to vector<2x1xf32>
    %162 = vector.extract_strided_slice %160 {offsets = [0, 1], sizes = [2, 1], strides = [1, 1]} : vector<2x2xf32> to vector<2x1xf32>
    %163 = vector.extract_strided_slice %21 {offsets = [0, 13], sizes = [2, 1], strides = [1, 1]} : vector<2x32xf32> to vector<2x1xf32>
    %164 = arith.mulf %4, %161 : vector<2x1xf32>
    %165 = arith.addf %163, %164 : vector<2x1xf32>
    %166 = arith.mulf %6, %161 : vector<2x1xf32>
    %167 = arith.addf %166, %12 : vector<2x1xf32>
    %168 = arith.mulf %8, %162 : vector<2x1xf32>
    %169 = arith.addf %167, %168 : vector<2x1xf32>
    %170 = tpu.concatenate %165, %169 in 1 : vector<2x1xf32>, vector<2x1xf32> -> vector<2x2xf32>
    %171 = math.tanh %170 : vector<2x2xf32>
    %172 = vector.extract_strided_slice %171 {offsets = [0, 0], sizes = [2, 1], strides = [1, 1]} : vector<2x2xf32> to vector<2x1xf32>
    %173 = vector.extract_strided_slice %171 {offsets = [0, 1], sizes = [2, 1], strides = [1, 1]} : vector<2x2xf32> to vector<2x1xf32>
    %174 = vector.extract_strided_slice %21 {offsets = [0, 14], sizes = [2, 1], strides = [1, 1]} : vector<2x32xf32> to vector<2x1xf32>
    %175 = arith.mulf %4, %172 : vector<2x1xf32>
    %176 = arith.addf %174, %175 : vector<2x1xf32>
    %177 = arith.mulf %6, %172 : vector<2x1xf32>
    %178 = arith.addf %177, %12 : vector<2x1xf32>
    %179 = arith.mulf %8, %173 : vector<2x1xf32>
    %180 = arith.addf %178, %179 : vector<2x1xf32>
    %181 = tpu.concatenate %176, %180 in 1 : vector<2x1xf32>, vector<2x1xf32> -> vector<2x2xf32>
    %182 = math.tanh %181 : vector<2x2xf32>
    %183 = vector.extract_strided_slice %182 {offsets = [0, 0], sizes = [2, 1], strides = [1, 1]} : vector<2x2xf32> to vector<2x1xf32>
    %184 = vector.extract_strided_slice %182 {offsets = [0, 1], sizes = [2, 1], strides = [1, 1]} : vector<2x2xf32> to vector<2x1xf32>
    %185 = vector.extract_strided_slice %21 {offsets = [0, 15], sizes = [2, 1], strides = [1, 1]} : vector<2x32xf32> to vector<2x1xf32>
    %186 = arith.mulf %4, %183 : vector<2x1xf32>
    %187 = arith.addf %185, %186 : vector<2x1xf32>
    %188 = arith.mulf %6, %183 : vector<2x1xf32>
    %189 = arith.addf %188, %12 : vector<2x1xf32>
    %190 = arith.mulf %8, %184 : vector<2x1xf32>
    %191 = arith.addf %189, %190 : vector<2x1xf32>
    %192 = tpu.concatenate %187, %191 in 1 : vector<2x1xf32>, vector<2x1xf32> -> vector<2x2xf32>
    %193 = math.tanh %192 : vector<2x2xf32>
    %194 = vector.extract_strided_slice %193 {offsets = [0, 0], sizes = [2, 1], strides = [1, 1]} : vector<2x2xf32> to vector<2x1xf32>
    %195 = vector.extract_strided_slice %193 {offsets = [0, 1], sizes = [2, 1], strides = [1, 1]} : vector<2x2xf32> to vector<2x1xf32>
    %196 = vector.extract_strided_slice %21 {offsets = [0, 16], sizes = [2, 1], strides = [1, 1]} : vector<2x32xf32> to vector<2x1xf32>
    %197 = arith.mulf %4, %194 : vector<2x1xf32>
    %198 = arith.addf %196, %197 : vector<2x1xf32>
    %199 = arith.mulf %6, %194 : vector<2x1xf32>
    %200 = arith.addf %199, %12 : vector<2x1xf32>
    %201 = arith.mulf %8, %195 : vector<2x1xf32>
    %202 = arith.addf %200, %201 : vector<2x1xf32>
    %203 = tpu.concatenate %198, %202 in 1 : vector<2x1xf32>, vector<2x1xf32> -> vector<2x2xf32>
    %204 = math.tanh %203 : vector<2x2xf32>
    %205 = vector.extract_strided_slice %204 {offsets = [0, 0], sizes = [2, 1], strides = [1, 1]} : vector<2x2xf32> to vector<2x1xf32>
    %206 = vector.extract_strided_slice %204 {offsets = [0, 1], sizes = [2, 1], strides = [1, 1]} : vector<2x2xf32> to vector<2x1xf32>
    %207 = vector.extract_strided_slice %21 {offsets = [0, 17], sizes = [2, 1], strides = [1, 1]} : vector<2x32xf32> to vector<2x1xf32>
    %208 = arith.mulf %4, %205 : vector<2x1xf32>
    %209 = arith.addf %207, %208 : vector<2x1xf32>
    %210 = arith.mulf %6, %205 : vector<2x1xf32>
    %211 = arith.addf %210, %12 : vector<2x1xf32>
    %212 = arith.mulf %8, %206 : vector<2x1xf32>
    %213 = arith.addf %211, %212 : vector<2x1xf32>
    %214 = tpu.concatenate %209, %213 in 1 : vector<2x1xf32>, vector<2x1xf32> -> vector<2x2xf32>
    %215 = math.tanh %214 : vector<2x2xf32>
    %216 = vector.extract_strided_slice %215 {offsets = [0, 0], sizes = [2, 1], strides = [1, 1]} : vector<2x2xf32> to vector<2x1xf32>
    %217 = vector.extract_strided_slice %215 {offsets = [0, 1], sizes = [2, 1], strides = [1, 1]} : vector<2x2xf32> to vector<2x1xf32>
    %218 = vector.extract_strided_slice %21 {offsets = [0, 18], sizes = [2, 1], strides = [1, 1]} : vector<2x32xf32> to vector<2x1xf32>
    %219 = arith.mulf %4, %216 : vector<2x1xf32>
    %220 = arith.addf %218, %219 : vector<2x1xf32>
    %221 = arith.mulf %6, %216 : vector<2x1xf32>
    %222 = arith.addf %221, %12 : vector<2x1xf32>
    %223 = arith.mulf %8, %217 : vector<2x1xf32>
    %224 = arith.addf %222, %223 : vector<2x1xf32>
    %225 = tpu.concatenate %220, %224 in 1 : vector<2x1xf32>, vector<2x1xf32> -> vector<2x2xf32>
    %226 = math.tanh %225 : vector<2x2xf32>
    %227 = vector.extract_strided_slice %226 {offsets = [0, 0], sizes = [2, 1], strides = [1, 1]} : vector<2x2xf32> to vector<2x1xf32>
    %228 = vector.extract_strided_slice %226 {offsets = [0, 1], sizes = [2, 1], strides = [1, 1]} : vector<2x2xf32> to vector<2x1xf32>
    %229 = vector.extract_strided_slice %21 {offsets = [0, 19], sizes = [2, 1], strides = [1, 1]} : vector<2x32xf32> to vector<2x1xf32>
    %230 = arith.mulf %4, %227 : vector<2x1xf32>
    %231 = arith.addf %229, %230 : vector<2x1xf32>
    %232 = arith.mulf %6, %227 : vector<2x1xf32>
    %233 = arith.addf %232, %12 : vector<2x1xf32>
    %234 = arith.mulf %8, %228 : vector<2x1xf32>
    %235 = arith.addf %233, %234 : vector<2x1xf32>
    %236 = tpu.concatenate %231, %235 in 1 : vector<2x1xf32>, vector<2x1xf32> -> vector<2x2xf32>
    %237 = math.tanh %236 : vector<2x2xf32>
    %238 = vector.extract_strided_slice %237 {offsets = [0, 0], sizes = [2, 1], strides = [1, 1]} : vector<2x2xf32> to vector<2x1xf32>
    %239 = vector.extract_strided_slice %237 {offsets = [0, 1], sizes = [2, 1], strides = [1, 1]} : vector<2x2xf32> to vector<2x1xf32>
    %240 = vector.extract_strided_slice %21 {offsets = [0, 20], sizes = [2, 1], strides = [1, 1]} : vector<2x32xf32> to vector<2x1xf32>
    %241 = arith.mulf %4, %238 : vector<2x1xf32>
    %242 = arith.addf %240, %241 : vector<2x1xf32>
    %243 = arith.mulf %6, %238 : vector<2x1xf32>
    %244 = arith.addf %243, %12 : vector<2x1xf32>
    %245 = arith.mulf %8, %239 : vector<2x1xf32>
    %246 = arith.addf %244, %245 : vector<2x1xf32>
    %247 = tpu.concatenate %242, %246 in 1 : vector<2x1xf32>, vector<2x1xf32> -> vector<2x2xf32>
    %248 = math.tanh %247 : vector<2x2xf32>
    %249 = vector.extract_strided_slice %248 {offsets = [0, 0], sizes = [2, 1], strides = [1, 1]} : vector<2x2xf32> to vector<2x1xf32>
    %250 = vector.extract_strided_slice %248 {offsets = [0, 1], sizes = [2, 1], strides = [1, 1]} : vector<2x2xf32> to vector<2x1xf32>
    %251 = vector.extract_strided_slice %21 {offsets = [0, 21], sizes = [2, 1], strides = [1, 1]} : vector<2x32xf32> to vector<2x1xf32>
    %252 = arith.mulf %4, %249 : vector<2x1xf32>
    %253 = arith.addf %251, %252 : vector<2x1xf32>
    %254 = arith.mulf %6, %249 : vector<2x1xf32>
    %255 = arith.addf %254, %12 : vector<2x1xf32>
    %256 = arith.mulf %8, %250 : vector<2x1xf32>
    %257 = arith.addf %255, %256 : vector<2x1xf32>
    %258 = tpu.concatenate %253, %257 in 1 : vector<2x1xf32>, vector<2x1xf32> -> vector<2x2xf32>
    %259 = math.tanh %258 : vector<2x2xf32>
    %260 = vector.extract_strided_slice %259 {offsets = [0, 0], sizes = [2, 1], strides = [1, 1]} : vector<2x2xf32> to vector<2x1xf32>
    %261 = vector.extract_strided_slice %259 {offsets = [0, 1], sizes = [2, 1], strides = [1, 1]} : vector<2x2xf32> to vector<2x1xf32>
    %262 = vector.extract_strided_slice %21 {offsets = [0, 22], sizes = [2, 1], strides = [1, 1]} : vector<2x32xf32> to vector<2x1xf32>
    %263 = arith.mulf %4, %260 : vector<2x1xf32>
    %264 = arith.addf %262, %263 : vector<2x1xf32>
    %265 = arith.mulf %6, %260 : vector<2x1xf32>
    %266 = arith.addf %265, %12 : vector<2x1xf32>
    %267 = arith.mulf %8, %261 : vector<2x1xf32>
    %268 = arith.addf %266, %267 : vector<2x1xf32>
    %269 = tpu.concatenate %264, %268 in 1 : vector<2x1xf32>, vector<2x1xf32> -> vector<2x2xf32>
    %270 = math.tanh %269 : vector<2x2xf32>
    %271 = vector.extract_strided_slice %270 {offsets = [0, 0], sizes = [2, 1], strides = [1, 1]} : vector<2x2xf32> to vector<2x1xf32>
    %272 = vector.extract_strided_slice %270 {offsets = [0, 1], sizes = [2, 1], strides = [1, 1]} : vector<2x2xf32> to vector<2x1xf32>
    %273 = vector.extract_strided_slice %21 {offsets = [0, 23], sizes = [2, 1], strides = [1, 1]} : vector<2x32xf32> to vector<2x1xf32>
    %274 = arith.mulf %4, %271 : vector<2x1xf32>
    %275 = arith.addf %273, %274 : vector<2x1xf32>
    %276 = arith.mulf %6, %271 : vector<2x1xf32>
    %277 = arith.addf %276, %12 : vector<2x1xf32>
    %278 = arith.mulf %8, %272 : vector<2x1xf32>
    %279 = arith.addf %277, %278 : vector<2x1xf32>
    %280 = tpu.concatenate %275, %279 in 1 : vector<2x1xf32>, vector<2x1xf32> -> vector<2x2xf32>
    %281 = math.tanh %280 : vector<2x2xf32>
    %282 = vector.extract_strided_slice %281 {offsets = [0, 0], sizes = [2, 1], strides = [1, 1]} : vector<2x2xf32> to vector<2x1xf32>
    %283 = vector.extract_strided_slice %281 {offsets = [0, 1], sizes = [2, 1], strides = [1, 1]} : vector<2x2xf32> to vector<2x1xf32>
    %284 = vector.extract_strided_slice %21 {offsets = [0, 24], sizes = [2, 1], strides = [1, 1]} : vector<2x32xf32> to vector<2x1xf32>
    %285 = arith.mulf %4, %282 : vector<2x1xf32>
    %286 = arith.addf %284, %285 : vector<2x1xf32>
    %287 = arith.mulf %6, %282 : vector<2x1xf32>
    %288 = arith.addf %287, %12 : vector<2x1xf32>
    %289 = arith.mulf %8, %283 : vector<2x1xf32>
    %290 = arith.addf %288, %289 : vector<2x1xf32>
    %291 = tpu.concatenate %286, %290 in 1 : vector<2x1xf32>, vector<2x1xf32> -> vector<2x2xf32>
    %292 = math.tanh %291 : vector<2x2xf32>
    %293 = vector.extract_strided_slice %292 {offsets = [0, 0], sizes = [2, 1], strides = [1, 1]} : vector<2x2xf32> to vector<2x1xf32>
    %294 = vector.extract_strided_slice %292 {offsets = [0, 1], sizes = [2, 1], strides = [1, 1]} : vector<2x2xf32> to vector<2x1xf32>
    %295 = vector.extract_strided_slice %21 {offsets = [0, 25], sizes = [2, 1], strides = [1, 1]} : vector<2x32xf32> to vector<2x1xf32>
    %296 = arith.mulf %4, %293 : vector<2x1xf32>
    %297 = arith.addf %295, %296 : vector<2x1xf32>
    %298 = arith.mulf %6, %293 : vector<2x1xf32>
    %299 = arith.addf %298, %12 : vector<2x1xf32>
    %300 = arith.mulf %8, %294 : vector<2x1xf32>
    %301 = arith.addf %299, %300 : vector<2x1xf32>
    %302 = tpu.concatenate %297, %301 in 1 : vector<2x1xf32>, vector<2x1xf32> -> vector<2x2xf32>
    %303 = math.tanh %302 : vector<2x2xf32>
    %304 = vector.extract_strided_slice %303 {offsets = [0, 0], sizes = [2, 1], strides = [1, 1]} : vector<2x2xf32> to vector<2x1xf32>
    %305 = vector.extract_strided_slice %303 {offsets = [0, 1], sizes = [2, 1], strides = [1, 1]} : vector<2x2xf32> to vector<2x1xf32>
    %306 = vector.extract_strided_slice %21 {offsets = [0, 26], sizes = [2, 1], strides = [1, 1]} : vector<2x32xf32> to vector<2x1xf32>
    %307 = arith.mulf %4, %304 : vector<2x1xf32>
    %308 = arith.addf %306, %307 : vector<2x1xf32>
    %309 = arith.mulf %6, %304 : vector<2x1xf32>
    %310 = arith.addf %309, %12 : vector<2x1xf32>
    %311 = arith.mulf %8, %305 : vector<2x1xf32>
    %312 = arith.addf %310, %311 : vector<2x1xf32>
    %313 = tpu.concatenate %308, %312 in 1 : vector<2x1xf32>, vector<2x1xf32> -> vector<2x2xf32>
    %314 = math.tanh %313 : vector<2x2xf32>
    %315 = vector.extract_strided_slice %314 {offsets = [0, 0], sizes = [2, 1], strides = [1, 1]} : vector<2x2xf32> to vector<2x1xf32>
    %316 = vector.extract_strided_slice %314 {offsets = [0, 1], sizes = [2, 1], strides = [1, 1]} : vector<2x2xf32> to vector<2x1xf32>
    %317 = vector.extract_strided_slice %21 {offsets = [0, 27], sizes = [2, 1], strides = [1, 1]} : vector<2x32xf32> to vector<2x1xf32>
    %318 = arith.mulf %4, %315 : vector<2x1xf32>
    %319 = arith.addf %317, %318 : vector<2x1xf32>
    %320 = arith.mulf %6, %315 : vector<2x1xf32>
    %321 = arith.addf %320, %12 : vector<2x1xf32>
    %322 = arith.mulf %8, %316 : vector<2x1xf32>
    %323 = arith.addf %321, %322 : vector<2x1xf32>
    %324 = tpu.concatenate %319, %323 in 1 : vector<2x1xf32>, vector<2x1xf32> -> vector<2x2xf32>
    %325 = math.tanh %324 : vector<2x2xf32>
    %326 = vector.extract_strided_slice %325 {offsets = [0, 0], sizes = [2, 1], strides = [1, 1]} : vector<2x2xf32> to vector<2x1xf32>
    %327 = vector.extract_strided_slice %325 {offsets = [0, 1], sizes = [2, 1], strides = [1, 1]} : vector<2x2xf32> to vector<2x1xf32>
    %328 = vector.extract_strided_slice %21 {offsets = [0, 28], sizes = [2, 1], strides = [1, 1]} : vector<2x32xf32> to vector<2x1xf32>
    %329 = arith.mulf %4, %326 : vector<2x1xf32>
    %330 = arith.addf %328, %329 : vector<2x1xf32>
    %331 = arith.mulf %6, %326 : vector<2x1xf32>
    %332 = arith.addf %331, %12 : vector<2x1xf32>
    %333 = arith.mulf %8, %327 : vector<2x1xf32>
    %334 = arith.addf %332, %333 : vector<2x1xf32>
    %335 = tpu.concatenate %330, %334 in 1 : vector<2x1xf32>, vector<2x1xf32> -> vector<2x2xf32>
    %336 = math.tanh %335 : vector<2x2xf32>
    %337 = vector.extract_strided_slice %336 {offsets = [0, 0], sizes = [2, 1], strides = [1, 1]} : vector<2x2xf32> to vector<2x1xf32>
    %338 = vector.extract_strided_slice %336 {offsets = [0, 1], sizes = [2, 1], strides = [1, 1]} : vector<2x2xf32> to vector<2x1xf32>
    %339 = vector.extract_strided_slice %21 {offsets = [0, 29], sizes = [2, 1], strides = [1, 1]} : vector<2x32xf32> to vector<2x1xf32>
    %340 = arith.mulf %4, %337 : vector<2x1xf32>
    %341 = arith.addf %339, %340 : vector<2x1xf32>
    %342 = arith.mulf %6, %337 : vector<2x1xf32>
    %343 = arith.addf %342, %12 : vector<2x1xf32>
    %344 = arith.mulf %8, %338 : vector<2x1xf32>
    %345 = arith.addf %343, %344 : vector<2x1xf32>
    %346 = tpu.concatenate %341, %345 in 1 : vector<2x1xf32>, vector<2x1xf32> -> vector<2x2xf32>
    %347 = math.tanh %346 : vector<2x2xf32>
    %348 = vector.extract_strided_slice %347 {offsets = [0, 0], sizes = [2, 1], strides = [1, 1]} : vector<2x2xf32> to vector<2x1xf32>
    %349 = vector.extract_strided_slice %347 {offsets = [0, 1], sizes = [2, 1], strides = [1, 1]} : vector<2x2xf32> to vector<2x1xf32>
    %350 = vector.extract_strided_slice %21 {offsets = [0, 30], sizes = [2, 1], strides = [1, 1]} : vector<2x32xf32> to vector<2x1xf32>
    %351 = arith.mulf %4, %348 : vector<2x1xf32>
    %352 = arith.addf %350, %351 : vector<2x1xf32>
    %353 = arith.mulf %6, %348 : vector<2x1xf32>
    %354 = arith.addf %353, %12 : vector<2x1xf32>
    %355 = arith.mulf %8, %349 : vector<2x1xf32>
    %356 = arith.addf %354, %355 : vector<2x1xf32>
    %357 = tpu.concatenate %352, %356 in 1 : vector<2x1xf32>, vector<2x1xf32> -> vector<2x2xf32>
    %358 = math.tanh %357 : vector<2x2xf32>
    %359 = vector.extract_strided_slice %358 {offsets = [0, 0], sizes = [2, 1], strides = [1, 1]} : vector<2x2xf32> to vector<2x1xf32>
    %360 = vector.extract_strided_slice %358 {offsets = [0, 1], sizes = [2, 1], strides = [1, 1]} : vector<2x2xf32> to vector<2x1xf32>
    %361 = vector.extract_strided_slice %21 {offsets = [0, 31], sizes = [2, 1], strides = [1, 1]} : vector<2x32xf32> to vector<2x1xf32>
    %362 = arith.mulf %4, %359 : vector<2x1xf32>
    %363 = arith.addf %361, %362 : vector<2x1xf32>
    %364 = arith.mulf %6, %359 : vector<2x1xf32>
    %365 = arith.addf %364, %12 : vector<2x1xf32>
    %366 = arith.mulf %8, %360 : vector<2x1xf32>
    %367 = arith.addf %365, %366 : vector<2x1xf32>
    %368 = tpu.concatenate %363, %367 in 1 : vector<2x1xf32>, vector<2x1xf32> -> vector<2x2xf32>
    %369 = math.tanh %368 : vector<2x2xf32>
    %370 = vector.extract_strided_slice %369 {offsets = [0, 0], sizes = [2, 1], strides = [1, 1]} : vector<2x2xf32> to vector<2x1xf32>
    %371 = vector.extract_strided_slice %369 {offsets = [0, 1], sizes = [2, 1], strides = [1, 1]} : vector<2x2xf32> to vector<2x1xf32>
    %372 = arith.mulf %6, %370 : vector<2x1xf32>
    %373 = arith.addf %372, %12 : vector<2x1xf32>
    %374 = arith.mulf %8, %371 : vector<2x1xf32>
    %375 = arith.addf %373, %374 : vector<2x1xf32>
    %376 = math.tanh %375 : vector<2x1xf32>
    %377 = tpu.concatenate %38, %49, %60, %71, %82, %93, %104, %115, %129, %140, %151, %162, %173, %184, %195, %206 in 1 : vector<2x1xf32>, vector<2x1xf32>, vector<2x1xf32>, vector<2x1xf32>, vector<2x1xf32>, vector<2x1xf32>, vector<2x1xf32>, vector<2x1xf32>, vector<2x1xf32>, vector<2x1xf32>, vector<2x1xf32>, vector<2x1xf32>, vector<2x1xf32>, vector<2x1xf32>, vector<2x1xf32>, vector<2x1xf32> -> vector<2x16xf32>
    %378 = tpu.concatenate %217, %228, %239, %250, %261, %272, %283, %294, %305, %316, %327, %338, %349, %360, %371, %376 in 1 : vector<2x1xf32>, vector<2x1xf32>, vector<2x1xf32>, vector<2x1xf32>, vector<2x1xf32>, vector<2x1xf32>, vector<2x1xf32>, vector<2x1xf32>, vector<2x1xf32>, vector<2x1xf32>, vector<2x1xf32>, vector<2x1xf32>, vector<2x1xf32>, vector<2x1xf32>, vector<2x1xf32>, vector<2x1xf32> -> vector<2x16xf32>
    %379 = tpu.concatenate %377, %378 in 1 : vector<2x16xf32>, vector<2x16xf32> -> vector<2x32xf32>
    %c0_9 = arith.constant 0 : index
    %c0_10 = arith.constant 0 : index
    %380 = vector.load %arg3[%c0_9, %c0_10] : memref<2x32xf32, #tpu.memory_space<vmem>>, vector<2x32xf32>
    tpu.vector_store %arg3[%c0_9, %c0_10], %379 {strides = array<i32>} : memref<2x32xf32, #tpu.memory_space<vmem>>, vector<2x32xf32>,
    %381 = tpu.concatenate %370, %376 in 1 : vector<2x1xf32>, vector<2x1xf32> -> vector<2x2xf32>
    %c0_11 = arith.constant 0 : index
    %c0_12 = arith.constant 0 : index
    %382 = vector.load %arg5[%c0_11, %c0_12] : memref<2x2xf32, #tpu.memory_space<vmem>>, vector<2x2xf32>
    tpu.vector_store %arg5[%c0_11, %c0_12], %381 {strides = array<i32>} : memref<2x2xf32, #tpu.memory_space<vmem>>, vector<2x2xf32>,
    return
  }
  func.func @transform_0(%arg0: i32) -> i32 {
    %c0_i32 = arith.constant 0 : i32
    %c0_i32_0 = arith.constant 0 : i32
    return %c0_i32 : i32
  }
  func.func @transform_1(%arg0: i32) -> (i32, i32) {
    %c0_i32 = arith.constant 0 : i32
    %c0_i32_0 = arith.constant 0 : i32
    return %c0_i32, %arg0 : i32, i32
  }
  func.func @transform_2(%arg0: i32) -> (i32, i32) {
    %c0_i32 = arith.constant 0 : i32
    %c0_i32_0 = arith.constant 0 : i32
    return %c0_i32, %arg0 : i32, i32
  }
  func.func @transform_3(%arg0: i32) -> (i32, i32) {
    %c0_i32 = arith.constant 0 : i32
    %c0_i32_0 = arith.constant 0 : i32
    %c0_i32_1 = arith.constant 0 : i32
    return %c0_i32, %c0_i32_0 : i32, i32
  }
}

</mosaic_0001>

<bundles_post_ra>
// kernel: my_balls_forward.1
= control target key start
LH: loop header
LB: loop body
LE: loop exit
PB: predicated region body
PF: predicated region fallthrough
CT: control target
= control target key end

     0   :  { %9 = vsyncpa [#allocation5], 0  ;;  %s1815_s0 = inlined_call_operand.vmem [shape: f32[8], index: 0, kind: input, shape index: {}]   ;;  %s1816_s1 = inlined_call_operand.vmem [shape: f32[2,32], index: 1, kind: input, shape index: {}]   ;;  %s1817_s2 = inlined_call_operand.hbm [shape: f32[2,32], index: 2, kind: output, shape index: {0}]   ;;  %s1818_s3 = inlined_call_operand.vmem [shape: f32[2,2], index: 3, kind: output, shape index: {1}]  }
   0x1   :  { %10 = vsyncpa [#allocation4], 0  ;;  %s16_s14 = sshll.u32 %s1815_s0, 4  ;;  %s1193_s15 = smov [#allocation3]   ;;  %s17_s14 = int_to_ptr.vmem [resolvable:$true] %s16_s14 }
   0x2   :  { %19 = dma.vmem_to_smem %s17_s14, 16, %s1193_s15, [#allocation5]  }
   0x3   :  { %1189 = dma.done.wait [#allocation5], 16  }
   0x4   :  { %1190 = vsyncadd [#allocation5], 4294967280 }
   0x5   :  { %26 = sfence }
   0x6   :  { %vm31_vm0 = vcmask 9216   ;;  %s1015_s16 = sld [smem:[#allocation3 + $0x1]]  ;;  %v1194_v0 = vmov 0.0   ;;  %v43_v1 = vld [vmem:[%s1816_s1] sm:$0x3]  ;;  %s1195_s23 = smov 1  }
   0x7   :  { %32 = vst.msk [vmem:[#allocation2] sm:$0x3] %vm31_vm0, %v1194_v0  ;;  %s44_s17 = sld [smem:[#allocation3]]  ;;  %s1196_s1 = smov 127   ;;  %vm78_vm1 = vcmask 7168   ;;  %vm877_vm2 = vcmask 15360  }
   0x8   :  { %s1020_s18 = sld [smem:[#allocation3 + $0x2]]  ;;  %s1197_s28 = smov 2   ;;  %vm879_vm3 = vcmask 23552   ;;  %vm881_vm4 = vcmask 31744   ;;  %vm883_vm5 = vcmask 39936   ;;  %vm885_vm6 = vcmask 48128  }
   0x9   :  { %s1021_s19 = sld [smem:[#allocation3 + $0x3]]  ;;  %s1198_s29 = smov 126   ;;  %vm887_vm7 = vcmask 56320   ;;  %vm889_vm8 = vcmask 64512   ;;  %vm891_vm9 = vcmask 72704   ;;  %vm893_vm10 = vcmask 80896  }
   0xa   :  { %s1017_s22 = sld [smem:[#allocation3 + $0x5]]  ;;  %s1199_s30 = smov 3   ;;  %vm895_vm11 = vcmask 89088   ;;  %vm897_vm12 = vcmask 97280   ;;  %vm899_vm13 = vcmask 105472   ;;  %vm901_vm14 = vcmask 113664  }
   0xb   :  { %s1016_s24 = sld [smem:[#allocation3 + $0x4]]  ;;  %s1200_s4 = smov 125   ;;  %vm903_vm15 = vcmask 121856  }
   0xc   :  { %v1285_v2 = vstv %s1015_s16  ;;  %s1018_s25 = sld [smem:[#allocation3 + $0x6]]  ;;  %s1201_s5 = smov 4  }
   0xd   :  { %v45_v3 = vstv %s44_s17  ;;  %s1019_s26 = sld [smem:[#allocation3 + $0x7]]  ;;  %s1202_s6 = smov 124  }
   0xe   :  { %v46_v4 = vmul.f32 %v45_v3, %v43_v1  ;;  %v52_v5 = vld [vmem:[#allocation2] sm:$0x3]  ;;  %s1203_s7 = smov 5   ;;  %s1204_s8 = smov 123  }
   0xf   :  { %s49_s0 = sadd.f32 %s1021_s19, %s1020_s18  ;;  %v53_v6 = vmul.f32 %v52_v5, %v1285_v2  ;;  %s1205_s9 = smov 6  }
  0x10   :  { %v1293_v12 = vstv %s1017_s22  ;;  %s1206_s10 = smov 122   ;;  %s1207_s11 = smov 7  }
  0x11   :  { %v50_v7 = vstv %s49_s0  ;;  %v64_v13 = vmul.f32 %v52_v5, %v1293_v12  ;;  %v1297_v14 = vstv %s1016_s24  ;;  %s1208_s12 = smov 121   ;;  %s1209_s13 = smov 8  }
  0x12   :  { %v1288_v8 = vadd.f32 %v50_v7, %v46_v4  ;;  %s1210_s14 = smov 120   ;;  %s1211_s17 = smov 9  }
  0x13   :  { %s41_s27 = sadd.f32 %s1019_s26, %s1018_s25  ;;  %s1212_s18 = smov 119  }
  0x14   :  { %v54_v9 = vadd.f32 %v53_v6, %v1288_v8  ;;  %s1214_s19 = smov 118   ;;  %s1215_s20 = smov 11  }
  0x15   :  { %v1301_v18 = vstv %s41_s27  ;;  %s1216_s21 = smov 117   ;;  %s1217_s0 = smov 12  }
  0x16   :  { %1087 = vtanh.f32 %v54_v9  ;;  %s1218_s22 = smov 116   ;;  %s1219_s24 = smov 13  }
  0x17   :  { %s1220_s25 = smov 115   ;;  %s1221_s26 = smov 14  }
  0x18   :  { %s1222_s27 = smov 114   ;;  %s1230_s15 = smov 110  }
  0x19   :  { %s1231_s16 = smov 19  }
  0x1c   :  { %v1088_v10 = vpop.eup %1087 }
  0x1d   :  { %v56_v11 = vmul.f32 %v1088_v10, %v1285_v2  ;;  %v62_v17 = vmul.f32 %v1088_v10, %v1297_v14 }
  0x1f   :  { %58 = vrot.lane.b32.xlu0 %v56_v11, %s1195_s23  ;;  %v63_v19 = vadd.f32 %v62_v17, %v1301_v18 }
  0x27   :  { %66 = vrot.lane.b32.xlu0 %v64_v13, %s1196_s1 }
  0x91   :  { %v59_v15 = vpop.permute.xlu0 %58 }
  0x92   :  { %v61_v16 = vadd.f32 %v59_v15, %v1288_v8 }
  0x94   :  { %71 = vrot.lane.b32.xlu1 %v61_v16, %s1196_s1 }
  0x99   :  { %v67_v20 = vpop.permute.xlu0 %66 }
  0x9a   :  { %v69_v21 = vadd.f32 %v67_v20, %v63_v19 }
  0x9c   :  { %75 = vrot.lane.b32.xlu1 %v69_v21, %s1195_s23 }
 0x106   :  { %v72_v22 = vpop.permute.xlu1 %71 }
 0x10e   :  { %v76_v23 = vpop.permute.xlu1 %75 }
 0x10f   :  { %v79_v24 = vsel %vm78_vm1, %v72_v22, %v76_v23 }
 0x110   :  { %1089 = vtanh.f32 %v79_v24 }
 0x116   :  { %v1307_v25 = vpop.eup %1089 }
 0x117   :  { %v81_v26 = vmul.f32 %v1307_v25, %v1285_v2  ;;  %v89_v27 = vmul.f32 %v1307_v25, %v1293_v12  ;;  %v87_v30 = vmul.f32 %v1307_v25, %v1297_v14 }
 0x119   :  { %83 = vrot.lane.b32.xlu2 %v81_v26, %s1197_s28  ;;  %v88_v31 = vadd.f32 %v87_v30, %v1301_v18 }
 0x121   :  { %91 = vrot.lane.b32.xlu2 %v89_v27, %s1196_s1 }
 0x173   :  { %v84_v28 = vpop.permute.xlu2 %83 }
 0x174   :  { %v86_v29 = vadd.f32 %v84_v28, %v1288_v8 }
 0x176   :  { %96 = vrot.lane.b32.xlu0 %v86_v29, %s1198_s29  ;;  %s1223_s29 = smov 15  }
 0x17b   :  { %v92_v32 = vpop.permute.xlu2 %91 }
 0x17c   :  { %v94_v33 = vadd.f32 %v92_v32, %v88_v31 }
 0x17e   :  { %100 = vrot.lane.b32.xlu1 %v94_v33, %s1195_s23 }
 0x1e8   :  { %v97_v34 = vpop.permute.xlu0 %96 }
 0x1f0   :  { %v101_v35 = vpop.permute.xlu1 %100 }
 0x1f1   :  { %v103_v36 = vsel %vm78_vm1, %v97_v34, %v101_v35 }
 0x1f2   :  { %1091 = vtanh.f32 %v103_v36 }
 0x1f8   :  { %v1321_v37 = vpop.eup %1091 }
 0x1f9   :  { %v113_v38 = vmul.f32 %v1321_v37, %v1293_v12  ;;  %v105_v39 = vmul.f32 %v1321_v37, %v1285_v2  ;;  %v111_v42 = vmul.f32 %v1321_v37, %v1297_v14 }
 0x1fb   :  { %115 = vrot.lane.b32.xlu0 %v113_v38, %s1196_s1  ;;  %107 = vrot.lane.b32.xlu2 %v105_v39, %s1199_s30  ;;  %v112_v43 = vadd.f32 %v111_v42, %v1301_v18 }
 0x255   :  { %v108_v40 = vpop.permute.xlu2 %107 }
 0x256   :  { %v110_v41 = vadd.f32 %v108_v40, %v1288_v8 }
 0x258   :  { %120 = vrot.lane.b32.xlu1 %v110_v41, %s1200_s4  ;;  %s1224_s4 = smov 113  }
 0x26d   :  { %v116_v44 = vpop.permute.xlu0 %115 }
 0x26e   :  { %v118_v45 = vadd.f32 %v116_v44, %v112_v43 }
 0x270   :  { %124 = vrot.lane.b32.xlu2 %v118_v45, %s1195_s23 }
 0x2ca   :  { %v121_v46 = vpop.permute.xlu1 %120  ;;  %v125_v47 = vpop.permute.xlu2 %124 }
 0x2cb   :  { %v127_v48 = vsel %vm78_vm1, %v121_v46, %v125_v47 }
 0x2cc   :  { %1093 = vtanh.f32 %v127_v48 }
 0x2d2   :  { %v1335_v49 = vpop.eup %1093 }
 0x2d3   :  { %v137_v50 = vmul.f32 %v1335_v49, %v1293_v12  ;;  %v129_v51 = vmul.f32 %v1335_v49, %v1285_v2  ;;  %v135_v52 = vmul.f32 %v1335_v49, %v1297_v14 }
 0x2d5   :  { %139 = vrot.lane.b32.xlu1 %v137_v50, %s1196_s1  ;;  %131 = vrot.lane.b32.xlu0 %v129_v51, %s1201_s5  ;;  %v136_v53 = vadd.f32 %v135_v52, %v1301_v18 }
 0x347   :  { %v140_v54 = vpop.permute.xlu1 %139  ;;  %v132_v55 = vpop.permute.xlu0 %131 }
 0x348   :  { %v142_v56 = vadd.f32 %v140_v54, %v136_v53  ;;  %v134_v57 = vadd.f32 %v132_v55, %v1288_v8 }
 0x34a   :  { %148 = vrot.lane.b32.xlu0 %v142_v56, %s1195_s23  ;;  %144 = vrot.lane.b32.xlu2 %v134_v57, %s1202_s6  ;;  %s1225_s6 = smov 16  }
 0x3a4   :  { %v145_v58 = vpop.permute.xlu2 %144 }
 0x3bc   :  { %v149_v59 = vpop.permute.xlu0 %148 }
 0x3bd   :  { %v151_v60 = vsel %vm78_vm1, %v145_v58, %v149_v59 }
 0x3be   :  { %1095 = vtanh.f32 %v151_v60 }
 0x3c4   :  { %v1349_v61 = vpop.eup %1095 }
 0x3c5   :  { %v161_v62 = vmul.f32 %v1349_v61, %v1293_v12  ;;  %v153_v63 = vmul.f32 %v1349_v61, %v1285_v2  ;;  %v159_v0 = vmul.f32 %v1349_v61, %v1297_v14 }
 0x3c7   :  { %163 = vrot.lane.b32.xlu2 %v161_v62, %s1196_s1  ;;  %155 = vrot.lane.b32.xlu1 %v153_v63, %s1203_s7  ;;  %v160_v1 = vadd.f32 %v159_v0, %v1301_v18 }
 0x421   :  { %v164_v3 = vpop.permute.xlu2 %163 }
 0x422   :  { %v166_v4 = vadd.f32 %v164_v3, %v160_v1 }
 0x424   :  { %172 = vrot.lane.b32.xlu1 %v166_v4, %s1195_s23 }
 0x439   :  { %v156_v5 = vpop.permute.xlu1 %155 }
 0x43a   :  { %v158_v6 = vadd.f32 %v156_v5, %v1288_v8 }
 0x43c   :  { %168 = vrot.lane.b32.xlu0 %v158_v6, %s1204_s8  ;;  %s1226_s8 = smov 112  }
 0x496   :  { %v173_v7 = vpop.permute.xlu1 %172 }
 0x4ae   :  { %v169_v9 = vpop.permute.xlu0 %168 }
 0x4af   :  { %v175_v10 = vsel %vm78_vm1, %v169_v9, %v173_v7 }
 0x4b0   :  { %1097 = vtanh.f32 %v175_v10 }
 0x4b6   :  { %v1363_v11 = vpop.eup %1097 }
 0x4b7   :  { %v185_v13 = vmul.f32 %v1363_v11, %v1293_v12  ;;  %v177_v15 = vmul.f32 %v1363_v11, %v1285_v2  ;;  %v183_v19 = vmul.f32 %v1363_v11, %v1297_v14 }
 0x4b9   :  { %187 = vrot.lane.b32.xlu0 %v185_v13, %s1196_s1  ;;  %179 = vrot.lane.b32.xlu2 %v177_v15, %s1205_s9  ;;  %v184_v20 = vadd.f32 %v183_v19, %v1301_v18 }
 0x513   :  { %v180_v16 = vpop.permute.xlu2 %179 }
 0x514   :  { %v182_v17 = vadd.f32 %v180_v16, %v1288_v8 }
 0x516   :  { %192 = vrot.lane.b32.xlu1 %v182_v17, %s1206_s10  ;;  %s1227_s10 = smov 17  }
 0x52b   :  { %v188_v21 = vpop.permute.xlu0 %187 }
 0x52c   :  { %v190_v22 = vadd.f32 %v188_v21, %v184_v20 }
 0x52e   :  { %196 = vrot.lane.b32.xlu2 %v190_v22, %s1195_s23 }
 0x588   :  { %v193_v23 = vpop.permute.xlu1 %192  ;;  %v197_v24 = vpop.permute.xlu2 %196 }
 0x589   :  { %v199_v26 = vsel %vm78_vm1, %v193_v23, %v197_v24 }
 0x58a   :  { %1099 = vtanh.f32 %v199_v26 }
 0x590   :  { %v1377_v27 = vpop.eup %1099 }
 0x591   :  { %v209_v28 = vmul.f32 %v1377_v27, %v1293_v12  ;;  %v201_v29 = vmul.f32 %v1377_v27, %v1285_v2  ;;  %v207_v30 = vmul.f32 %v1377_v27, %v1297_v14 }
 0x593   :  { %211 = vrot.lane.b32.xlu1 %v209_v28, %s1196_s1  ;;  %203 = vrot.lane.b32.xlu0 %v201_v29, %s1207_s11  ;;  %v208_v31 = vadd.f32 %v207_v30, %v1301_v18 }
 0x605   :  { %v212_v32 = vpop.permute.xlu1 %211  ;;  %v204_v33 = vpop.permute.xlu0 %203 }
 0x606   :  { %v214_v34 = vadd.f32 %v212_v32, %v208_v31  ;;  %v206_v35 = vadd.f32 %v204_v33, %v1288_v8 }
 0x608   :  { %220 = vrot.lane.b32.xlu0 %v214_v34, %s1195_s23  ;;  %216 = vrot.lane.b32.xlu2 %v206_v35, %s1208_s12  ;;  %s1228_s12 = smov 111  }
 0x662   :  { %v217_v36 = vpop.permute.xlu2 %216 }
 0x67a   :  { %v221_v38 = vpop.permute.xlu0 %220 }
 0x67b   :  { %v223_v39 = vsel %vm78_vm1, %v217_v36, %v221_v38 }
 0x67c   :  { %1101 = vtanh.f32 %v223_v39 }
 0x682   :  { %v1391_v40 = vpop.eup %1101 }
 0x683   :  { %v233_v41 = vmul.f32 %v1391_v40, %v1293_v12  ;;  %v225_v42 = vmul.f32 %v1391_v40, %v1285_v2  ;;  %v231_v43 = vmul.f32 %v1391_v40, %v1297_v14 }
 0x685   :  { %235 = vrot.lane.b32.xlu2 %v233_v41, %s1196_s1  ;;  %227 = vrot.lane.b32.xlu1 %v225_v42, %s1209_s13  ;;  %v232_v44 = vadd.f32 %v231_v43, %v1301_v18 }
 0x6df   :  { %v236_v45 = vpop.permute.xlu2 %235 }
 0x6e0   :  { %v238_v46 = vadd.f32 %v236_v45, %v232_v44 }
 0x6e2   :  { %244 = vrot.lane.b32.xlu1 %v238_v46, %s1195_s23 }
 0x6f7   :  { %v228_v47 = vpop.permute.xlu1 %227 }
 0x6f8   :  { %v230_v48 = vadd.f32 %v228_v47, %v1288_v8 }
 0x6fa   :  { %240 = vrot.lane.b32.xlu0 %v230_v48, %s1210_s14  ;;  %s1229_s14 = smov 18  }
 0x754   :  { %v245_v50 = vpop.permute.xlu1 %244 }
 0x76c   :  { %v241_v51 = vpop.permute.xlu0 %240 }
 0x76d   :  { %v247_v52 = vsel %vm78_vm1, %v241_v51, %v245_v50 }
 0x76e   :  { %1103 = vtanh.f32 %v247_v52 }
 0x774   :  { %v1405_v53 = vpop.eup %1103 }
 0x775   :  { %v252_v54 = vsel %vm78_vm1, %v1391_v40, %v1405_v53  ;;  %v263_v55 = vmul.f32 %v1405_v53, %v1293_v12  ;;  %v255_v56 = vmul.f32 %v1405_v53, %v1285_v2  ;;  %v261_v59 = vmul.f32 %v1405_v53, %v1297_v14 }
 0x776   :  { %254 = vst.msk [vmem:[%s1818_s3] sm:$0x3] %vm31_vm0, %v252_v54  ;;  %s1213_s3 = smov 10  }
 0x777   :  { %265 = vrot.lane.b32.xlu0 %v263_v55, %s1196_s1  ;;  %257 = vrot.lane.b32.xlu2 %v255_v56, %s1211_s17  ;;  %v262_v60 = vadd.f32 %v261_v59, %v1301_v18 }
 0x7d1   :  { %v258_v57 = vpop.permute.xlu2 %257 }
 0x7d2   :  { %v260_v58 = vadd.f32 %v258_v57, %v1288_v8 }
 0x7d4   :  { %270 = vrot.lane.b32.xlu1 %v260_v58, %s1212_s18  ;;  %s1232_s18 = smov 109  }
 0x7e9   :  { %v266_v62 = vpop.permute.xlu0 %265 }
 0x7ea   :  { %v268_v63 = vadd.f32 %v266_v62, %v262_v60 }
 0x7ec   :  { %274 = vrot.lane.b32.xlu2 %v268_v63, %s1195_s23 }
 0x846   :  { %v271_v0 = vpop.permute.xlu1 %270  ;;  %v275_v1 = vpop.permute.xlu2 %274 }
 0x847   :  { %v277_v3 = vsel %vm78_vm1, %v271_v0, %v275_v1 }
 0x848   :  { %1105 = vtanh.f32 %v277_v3 }
 0x84e   :  { %v1426_v4 = vpop.eup %1105 }
 0x84f   :  { %v287_v5 = vmul.f32 %v1426_v4, %v1293_v12  ;;  %v279_v6 = vmul.f32 %v1426_v4, %v1285_v2  ;;  %v285_v7 = vmul.f32 %v1426_v4, %v1297_v14 }
 0x851   :  { %289 = vrot.lane.b32.xlu1 %v287_v5, %s1196_s1  ;;  %281 = vrot.lane.b32.xlu0 %v279_v6, %s1213_s3  ;;  %v286_v9 = vadd.f32 %v285_v7, %v1301_v18 }
 0x8c3   :  { %v290_v10 = vpop.permute.xlu1 %289  ;;  %v282_v13 = vpop.permute.xlu0 %281 }
 0x8c4   :  { %v292_v15 = vadd.f32 %v290_v10, %v286_v9  ;;  %v284_v16 = vadd.f32 %v282_v13, %v1288_v8 }
 0x8c6   :  { %298 = vrot.lane.b32.xlu0 %v292_v15, %s1195_s23  ;;  %294 = vrot.lane.b32.xlu2 %v284_v16, %s1214_s19  ;;  %s1233_s19 = smov 20  }
 0x920   :  { %v295_v17 = vpop.permute.xlu2 %294 }
 0x938   :  { %v299_v19 = vpop.permute.xlu0 %298 }
 0x939   :  { %v301_v20 = vsel %vm78_vm1, %v295_v17, %v299_v19 }
 0x93a   :  { %1107 = vtanh.f32 %v301_v20 }
 0x940   :  { %v1440_v21 = vpop.eup %1107 }
 0x941   :  { %v311_v22 = vmul.f32 %v1440_v21, %v1293_v12  ;;  %v303_v23 = vmul.f32 %v1440_v21, %v1285_v2  ;;  %v309_v24 = vmul.f32 %v1440_v21, %v1297_v14 }
 0x943   :  { %313 = vrot.lane.b32.xlu2 %v311_v22, %s1196_s1  ;;  %305 = vrot.lane.b32.xlu1 %v303_v23, %s1215_s20  ;;  %v310_v26 = vadd.f32 %v309_v24, %v1301_v18 }
 0x99d   :  { %v314_v28 = vpop.permute.xlu2 %313 }
 0x99e   :  { %v316_v29 = vadd.f32 %v314_v28, %v310_v26 }
 0x9a0   :  { %322 = vrot.lane.b32.xlu1 %v316_v29, %s1195_s23 }
 0x9b5   :  { %v306_v30 = vpop.permute.xlu1 %305 }
 0x9b6   :  { %v308_v31 = vadd.f32 %v306_v30, %v1288_v8 }
 0x9b8   :  { %318 = vrot.lane.b32.xlu0 %v308_v31, %s1216_s21  ;;  %s1234_s21 = smov 108  }
 0xa12   :  { %v323_v32 = vpop.permute.xlu1 %322 }
 0xa2a   :  { %v319_v33 = vpop.permute.xlu0 %318 }
 0xa2b   :  { %v325_v34 = vsel %vm78_vm1, %v319_v33, %v323_v32 }
 0xa2c   :  { %1109 = vtanh.f32 %v325_v34 }
 0xa32   :  { %v1454_v35 = vpop.eup %1109 }
 0xa33   :  { %v335_v36 = vmul.f32 %v1454_v35, %v1293_v12  ;;  %v327_v38 = vmul.f32 %v1454_v35, %v1285_v2  ;;  %v333_v42 = vmul.f32 %v1454_v35, %v1297_v14 }
 0xa35   :  { %337 = vrot.lane.b32.xlu0 %v335_v36, %s1196_s1  ;;  %329 = vrot.lane.b32.xlu2 %v327_v38, %s1217_s0  ;;  %v334_v43 = vadd.f32 %v333_v42, %v1301_v18 }
 0xa8f   :  { %v330_v39 = vpop.permute.xlu2 %329 }
 0xa90   :  { %v332_v41 = vadd.f32 %v330_v39, %v1288_v8 }
 0xa92   :  { %342 = vrot.lane.b32.xlu1 %v332_v41, %s1218_s22  ;;  %s1235_s22 = smov 21  }
 0xaa7   :  { %v338_v44 = vpop.permute.xlu0 %337 }
 0xaa8   :  { %v340_v45 = vadd.f32 %v338_v44, %v334_v43 }
 0xaaa   :  { %346 = vrot.lane.b32.xlu2 %v340_v45, %s1195_s23 }
 0xb04   :  { %v343_v46 = vpop.permute.xlu1 %342  ;;  %v347_v47 = vpop.permute.xlu2 %346 }
 0xb05   :  { %v349_v48 = vsel %vm78_vm1, %v343_v46, %v347_v47 }
 0xb06   :  { %1111 = vtanh.f32 %v349_v48 }
 0xb0c   :  { %v1468_v50 = vpop.eup %1111 }
 0xb0d   :  { %v359_v51 = vmul.f32 %v1468_v50, %v1293_v12  ;;  %v351_v52 = vmul.f32 %v1468_v50, %v1285_v2  ;;  %v357_v54 = vmul.f32 %v1468_v50, %v1297_v14 }
 0xb0f   :  { %361 = vrot.lane.b32.xlu1 %v359_v51, %s1196_s1  ;;  %353 = vrot.lane.b32.xlu0 %v351_v52, %s1219_s24  ;;  %v358_v55 = vadd.f32 %v357_v54, %v1301_v18 }
 0xb81   :  { %v362_v56 = vpop.permute.xlu1 %361  ;;  %v354_v57 = vpop.permute.xlu0 %353 }
 0xb82   :  { %v364_v58 = vadd.f32 %v362_v56, %v358_v55  ;;  %v356_v59 = vadd.f32 %v354_v57, %v1288_v8 }
 0xb84   :  { %370 = vrot.lane.b32.xlu0 %v364_v58, %s1195_s23  ;;  %366 = vrot.lane.b32.xlu2 %v356_v59, %s1220_s25  ;;  %s1236_s25 = smov 107  }
 0xbde   :  { %v367_v60 = vpop.permute.xlu2 %366 }
 0xbf6   :  { %v371_v62 = vpop.permute.xlu0 %370 }
 0xbf7   :  { %v373_v63 = vsel %vm78_vm1, %v367_v60, %v371_v62 }
 0xbf8   :  { %1113 = vtanh.f32 %v373_v63 }
 0xbfe   :  { %v1482_v0 = vpop.eup %1113 }
 0xbff   :  { %v383_v1 = vmul.f32 %v1482_v0, %v1293_v12  ;;  %v375_v3 = vmul.f32 %v1482_v0, %v1285_v2  ;;  %v381_v5 = vmul.f32 %v1482_v0, %v1297_v14 }
 0xc01   :  { %385 = vrot.lane.b32.xlu2 %v383_v1, %s1196_s1  ;;  %377 = vrot.lane.b32.xlu1 %v375_v3, %s1221_s26  ;;  %v382_v6 = vadd.f32 %v381_v5, %v1301_v18 }
 0xc5b   :  { %v386_v7 = vpop.permute.xlu2 %385 }
 0xc5c   :  { %v388_v9 = vadd.f32 %v386_v7, %v382_v6 }
 0xc5e   :  { %394 = vrot.lane.b32.xlu1 %v388_v9, %s1195_s23 }
 0xc73   :  { %v378_v10 = vpop.permute.xlu1 %377 }
 0xc74   :  { %v380_v13 = vadd.f32 %v378_v10, %v1288_v8 }
 0xc76   :  { %390 = vrot.lane.b32.xlu0 %v380_v13, %s1222_s27  ;;  %s1237_s27 = smov 22  }
 0xcd0   :  { %v395_v15 = vpop.permute.xlu1 %394 }
 0xce8   :  { %v391_v16 = vpop.permute.xlu0 %390 }
 0xce9   :  { %v397_v17 = vsel %vm78_vm1, %v391_v16, %v395_v15 }
 0xcea   :  { %1115 = vtanh.f32 %v397_v17 }
 0xcf0   :  { %v1496_v19 = vpop.eup %1115 }
 0xcf1   :  { %v407_v20 = vmul.f32 %v1496_v19, %v1293_v12  ;;  %v399_v22 = vmul.f32 %v1496_v19, %v1285_v2  ;;  %v405_v26 = vmul.f32 %v1496_v19, %v1297_v14 }
 0xcf3   :  { %409 = vrot.lane.b32.xlu0 %v407_v20, %s1196_s1  ;;  %401 = vrot.lane.b32.xlu2 %v399_v22, %s1223_s29  ;;  %v406_v28 = vadd.f32 %v405_v26, %v1301_v18 }
 0xd4d   :  { %v402_v23 = vpop.permute.xlu2 %401 }
 0xd4e   :  { %v404_v24 = vadd.f32 %v402_v23, %v1288_v8 }
 0xd50   :  { %414 = vrot.lane.b32.xlu1 %v404_v24, %s1224_s4  ;;  %s1238_s4 = smov 106  }
 0xd65   :  { %v410_v29 = vpop.permute.xlu0 %409 }
 0xd66   :  { %v412_v30 = vadd.f32 %v410_v29, %v406_v28 }
 0xd68   :  { %418 = vrot.lane.b32.xlu2 %v412_v30, %s1195_s23 }
 0xdc2   :  { %v415_v31 = vpop.permute.xlu1 %414  ;;  %v419_v32 = vpop.permute.xlu2 %418 }
 0xdc3   :  { %v421_v33 = vsel %vm78_vm1, %v415_v31, %v419_v32 }
 0xdc4   :  { %1117 = vtanh.f32 %v421_v33 }
 0xdca   :  { %v1510_v34 = vpop.eup %1117 }
 0xdcb   :  { %v431_v36 = vmul.f32 %v1510_v34, %v1293_v12  ;;  %v423_v38 = vmul.f32 %v1510_v34, %v1285_v2  ;;  %v429_v39 = vmul.f32 %v1510_v34, %v1297_v14 }
 0xdcd   :  { %433 = vrot.lane.b32.xlu1 %v431_v36, %s1196_s1  ;;  %425 = vrot.lane.b32.xlu0 %v423_v38, %s1225_s6  ;;  %v430_v41 = vadd.f32 %v429_v39, %v1301_v18 }
 0xe3f   :  { %v434_v42 = vpop.permute.xlu1 %433  ;;  %v426_v43 = vpop.permute.xlu0 %425 }
 0xe40   :  { %v436_v44 = vadd.f32 %v434_v42, %v430_v41  ;;  %v428_v45 = vadd.f32 %v426_v43, %v1288_v8 }
 0xe42   :  { %442 = vrot.lane.b32.xlu0 %v436_v44, %s1195_s23  ;;  %438 = vrot.lane.b32.xlu2 %v428_v45, %s1226_s8  ;;  %s1239_s8 = smov 23  }
 0xe9c   :  { %v439_v46 = vpop.permute.xlu2 %438 }
 0xeb4   :  { %v443_v47 = vpop.permute.xlu0 %442 }
 0xeb5   :  { %v445_v48 = vsel %vm78_vm1, %v439_v46, %v443_v47 }
 0xeb6   :  { %1119 = vtanh.f32 %v445_v48 }
 0xebc   :  { %v1524_v51 = vpop.eup %1119 }
 0xebd   :  { %v455_v52 = vmul.f32 %v1524_v51, %v1293_v12  ;;  %v447_v54 = vmul.f32 %v1524_v51, %v1285_v2  ;;  %v453_v55 = vmul.f32 %v1524_v51, %v1297_v14 }
 0xebf   :  { %457 = vrot.lane.b32.xlu2 %v455_v52, %s1196_s1  ;;  %449 = vrot.lane.b32.xlu1 %v447_v54, %s1227_s10  ;;  %v454_v56 = vadd.f32 %v453_v55, %v1301_v18  ;;  %s1240_s10 = smov 105  }
 0xf19   :  { %v458_v57 = vpop.permute.xlu2 %457 }
 0xf1a   :  { %v460_v58 = vadd.f32 %v458_v57, %v454_v56 }
 0xf1c   :  { %466 = vrot.lane.b32.xlu1 %v460_v58, %s1195_s23 }
 0xf31   :  { %v450_v59 = vpop.permute.xlu1 %449 }
 0xf32   :  { %v452_v60 = vadd.f32 %v450_v59, %v1288_v8 }
 0xf34   :  { %462 = vrot.lane.b32.xlu0 %v452_v60, %s1228_s12  ;;  %s1241_s12 = smov 24  }
 0xf8e   :  { %v467_v62 = vpop.permute.xlu1 %466 }
 0xfa6   :  { %v463_v63 = vpop.permute.xlu0 %462 }
 0xfa7   :  { %v469_v1 = vsel %vm78_vm1, %v463_v63, %v467_v62 }
 0xfa8   :  { %1121 = vtanh.f32 %v469_v1 }
 0xfae   :  { %v1537_v3 = vpop.eup %1121 }
 0xfaf   :  { %v479_v5 = vmul.f32 %v1537_v3, %v1293_v12  ;;  %v471_v6 = vmul.f32 %v1537_v3, %v1285_v2  ;;  %v477_v10 = vmul.f32 %v1537_v3, %v1297_v14 }
 0xfb1   :  { %481 = vrot.lane.b32.xlu0 %v479_v5, %s1196_s1  ;;  %473 = vrot.lane.b32.xlu2 %v471_v6, %s1229_s14  ;;  %v478_v13 = vadd.f32 %v477_v10, %v1301_v18  ;;  %s1242_s14 = smov 104  }
0x100b   :  { %v474_v7 = vpop.permute.xlu2 %473 }
0x100c   :  { %v476_v9 = vadd.f32 %v474_v7, %v1288_v8 }
0x100e   :  { %486 = vrot.lane.b32.xlu1 %v476_v9, %s1230_s15  ;;  %s1243_s15 = smov 25  }
0x1023   :  { %v482_v15 = vpop.permute.xlu0 %481 }
0x1024   :  { %v484_v16 = vadd.f32 %v482_v15, %v478_v13 }
0x1026   :  { %490 = vrot.lane.b32.xlu2 %v484_v16, %s1195_s23 }
0x1080   :  { %v487_v17 = vpop.permute.xlu1 %486  ;;  %v491_v20 = vpop.permute.xlu2 %490 }
0x1081   :  { %v493_v22 = vsel %vm78_vm1, %v487_v17, %v491_v20 }
0x1082   :  { %1123 = vtanh.f32 %v493_v22 }
0x1088   :  { %v1550_v23 = vpop.eup %1123 }
0x1089   :  { %v503_v24 = vmul.f32 %v1550_v23, %v1293_v12  ;;  %v495_v26 = vmul.f32 %v1550_v23, %v1285_v2  ;;  %v501_v28 = vmul.f32 %v1550_v23, %v1297_v14 }
0x108b   :  { %505 = vrot.lane.b32.xlu1 %v503_v24, %s1196_s1  ;;  %497 = vrot.lane.b32.xlu0 %v495_v26, %s1231_s16  ;;  %v502_v29 = vadd.f32 %v501_v28, %v1301_v18  ;;  %s1244_s16 = smov 103  }
0x10fd   :  { %v506_v30 = vpop.permute.xlu1 %505  ;;  %v498_v31 = vpop.permute.xlu0 %497 }
0x10fe   :  { %v508_v32 = vadd.f32 %v506_v30, %v502_v29  ;;  %v500_v33 = vadd.f32 %v498_v31, %v1288_v8 }
0x1100   :  { %514 = vrot.lane.b32.xlu0 %v508_v32, %s1195_s23  ;;  %510 = vrot.lane.b32.xlu2 %v500_v33, %s1232_s18  ;;  %s1245_s18 = smov 26  }
0x115a   :  { %v511_v36 = vpop.permute.xlu2 %510 }
0x1172   :  { %v515_v38 = vpop.permute.xlu0 %514 }
0x1173   :  { %v517_v39 = vsel %vm78_vm1, %v511_v36, %v515_v38 }
0x1174   :  { %1125 = vtanh.f32 %v517_v39 }
0x117a   :  { %v1563_v41 = vpop.eup %1125 }
0x117b   :  { %v527_v42 = vmul.f32 %v1563_v41, %v1293_v12  ;;  %v519_v43 = vmul.f32 %v1563_v41, %v1285_v2  ;;  %v525_v44 = vmul.f32 %v1563_v41, %v1297_v14 }
0x117d   :  { %529 = vrot.lane.b32.xlu2 %v527_v42, %s1196_s1  ;;  %521 = vrot.lane.b32.xlu1 %v519_v43, %s1233_s19  ;;  %v526_v45 = vadd.f32 %v525_v44, %v1301_v18  ;;  %s1246_s19 = smov 102  }
0x11d7   :  { %v530_v46 = vpop.permute.xlu2 %529 }
0x11d8   :  { %v532_v47 = vadd.f32 %v530_v46, %v526_v45 }
0x11da   :  { %538 = vrot.lane.b32.xlu1 %v532_v47, %s1195_s23 }
0x11ef   :  { %v522_v48 = vpop.permute.xlu1 %521 }
0x11f0   :  { %v524_v52 = vadd.f32 %v522_v48, %v1288_v8 }
0x11f2   :  { %534 = vrot.lane.b32.xlu0 %v524_v52, %s1234_s21  ;;  %s1247_s21 = smov 27  }
0x124c   :  { %v539_v54 = vpop.permute.xlu1 %538 }
0x1264   :  { %v535_v55 = vpop.permute.xlu0 %534 }
0x1265   :  { %v541_v56 = vsel %vm78_vm1, %v535_v55, %v539_v54 }
0x1266   :  { %1127 = vtanh.f32 %v541_v56 }
0x126c   :  { %v1576_v57 = vpop.eup %1127 }
0x126d   :  { %v551_v58 = vmul.f32 %v1576_v57, %v1293_v12  ;;  %v543_v59 = vmul.f32 %v1576_v57, %v1285_v2  ;;  %v549_v63 = vmul.f32 %v1576_v57, %v1297_v14 }
0x126f   :  { %553 = vrot.lane.b32.xlu0 %v551_v58, %s1196_s1  ;;  %545 = vrot.lane.b32.xlu2 %v543_v59, %s1235_s22  ;;  %v550_v1 = vadd.f32 %v549_v63, %v1301_v18  ;;  %s1248_s22 = smov 101  }
0x12c9   :  { %v546_v60 = vpop.permute.xlu2 %545 }
0x12ca   :  { %v548_v62 = vadd.f32 %v546_v60, %v1288_v8 }
0x12cc   :  { %558 = vrot.lane.b32.xlu1 %v548_v62, %s1236_s25  ;;  %s1249_s25 = smov 28  }
0x12e1   :  { %v554_v5 = vpop.permute.xlu0 %553 }
0x12e2   :  { %v556_v6 = vadd.f32 %v554_v5, %v550_v1 }
0x12e4   :  { %562 = vrot.lane.b32.xlu2 %v556_v6, %s1195_s23 }
0x133e   :  { %v559_v7 = vpop.permute.xlu1 %558  ;;  %v563_v9 = vpop.permute.xlu2 %562 }
0x133f   :  { %v565_v10 = vsel %vm78_vm1, %v559_v7, %v563_v9 }
0x1340   :  { %1129 = vtanh.f32 %v565_v10 }
0x1346   :  { %v1589_v13 = vpop.eup %1129 }
0x1347   :  { %v575_v15 = vmul.f32 %v1589_v13, %v1293_v12  ;;  %v567_v16 = vmul.f32 %v1589_v13, %v1285_v2  ;;  %v573_v17 = vmul.f32 %v1589_v13, %v1297_v14 }
0x1349   :  { %577 = vrot.lane.b32.xlu1 %v575_v15, %s1196_s1  ;;  %569 = vrot.lane.b32.xlu0 %v567_v16, %s1237_s27  ;;  %v574_v20 = vadd.f32 %v573_v17, %v1301_v18  ;;  %s1250_s27 = smov 100  }
0x13bb   :  { %v578_v22 = vpop.permute.xlu1 %577  ;;  %v570_v24 = vpop.permute.xlu0 %569 }
0x13bc   :  { %v580_v26 = vadd.f32 %v578_v22, %v574_v20  ;;  %v572_v28 = vadd.f32 %v570_v24, %v1288_v8 }
0x13be   :  { %586 = vrot.lane.b32.xlu0 %v580_v26, %s1195_s23  ;;  %582 = vrot.lane.b32.xlu2 %v572_v28, %s1238_s4  ;;  %s1251_s4 = smov 29  }
0x1418   :  { %v583_v29 = vpop.permute.xlu2 %582 }
0x1430   :  { %v587_v30 = vpop.permute.xlu0 %586 }
0x1431   :  { %v589_v31 = vsel %vm78_vm1, %v583_v29, %v587_v30 }
0x1432   :  { %1131 = vtanh.f32 %v589_v31 }
0x1438   :  { %v1602_v32 = vpop.eup %1131 }
0x1439   :  { %v599_v33 = vmul.f32 %v1602_v32, %v1293_v12  ;;  %v591_v36 = vmul.f32 %v1602_v32, %v1285_v2  ;;  %v597_v38 = vmul.f32 %v1602_v32, %v1297_v14 }
0x143b   :  { %601 = vrot.lane.b32.xlu2 %v599_v33, %s1196_s1  ;;  %593 = vrot.lane.b32.xlu1 %v591_v36, %s1239_s8  ;;  %v598_v39 = vadd.f32 %v597_v38, %v1301_v18  ;;  %s1252_s8 = smov 99  }
0x1495   :  { %v602_v42 = vpop.permute.xlu2 %601 }
0x1496   :  { %v604_v43 = vadd.f32 %v602_v42, %v598_v39 }
0x1498   :  { %610 = vrot.lane.b32.xlu1 %v604_v43, %s1195_s23 }
0x14ad   :  { %v594_v44 = vpop.permute.xlu1 %593 }
0x14ae   :  { %v596_v45 = vadd.f32 %v594_v44, %v1288_v8 }
0x14b0   :  { %606 = vrot.lane.b32.xlu0 %v596_v45, %s1240_s10  ;;  %s1253_s10 = smov 30  }
0x150a   :  { %v611_v46 = vpop.permute.xlu1 %610 }
0x1522   :  { %v607_v47 = vpop.permute.xlu0 %606 }
0x1523   :  { %v613_v48 = vsel %vm78_vm1, %v607_v47, %v611_v46 }
0x1524   :  { %1133 = vtanh.f32 %v613_v48 }
0x152a   :  { %v1615_v52 = vpop.eup %1133 }
0x152b   :  { %v623_v54 = vmul.f32 %v1615_v52, %v1293_v12  ;;  %v615_v55 = vmul.f32 %v1615_v52, %v1285_v2  ;;  %v621_v59 = vmul.f32 %v1615_v52, %v1297_v14 }
0x152d   :  { %625 = vrot.lane.b32.xlu0 %v623_v54, %s1196_s1  ;;  %617 = vrot.lane.b32.xlu2 %v615_v55, %s1241_s12  ;;  %v622_v60 = vadd.f32 %v621_v59, %v1301_v18  ;;  %s1254_s12 = smov 98  }
0x1587   :  { %v618_v56 = vpop.permute.xlu2 %617 }
0x1588   :  { %v620_v58 = vadd.f32 %v618_v56, %v1288_v8 }
0x158a   :  { %630 = vrot.lane.b32.xlu1 %v620_v58, %s1242_s14  ;;  %s1255_s14 = smov 31  }
0x159f   :  { %v626_v62 = vpop.permute.xlu0 %625 }
0x15a0   :  { %v628_v63 = vadd.f32 %v626_v62, %v622_v60 }
0x15a2   :  { %634 = vrot.lane.b32.xlu2 %v628_v63, %s1195_s23 }
0x15fc   :  { %v631_v1 = vpop.permute.xlu1 %630  ;;  %v635_v5 = vpop.permute.xlu2 %634 }
0x15fd   :  { %v637_v6 = vsel %vm78_vm1, %v631_v1, %v635_v5 }
0x15fe   :  { %1135 = vtanh.f32 %v637_v6 }
0x1604   :  { %v1628_v7 = vpop.eup %1135 }
0x1605   :  { %v647_v9 = vmul.f32 %v1628_v7, %v1293_v12  ;;  %v639_v10 = vmul.f32 %v1628_v7, %v1285_v2  ;;  %v645_v15 = vmul.f32 %v1628_v7, %v1297_v14 }
0x1607   :  { %649 = vrot.lane.b32.xlu1 %v647_v9, %s1196_s1  ;;  %641 = vrot.lane.b32.xlu0 %v639_v10, %s1243_s15  ;;  %v646_v16 = vadd.f32 %v645_v15, %v1301_v18  ;;  %s1256_s15 = smov 97  }
0x1679   :  { %v650_v17 = vpop.permute.xlu1 %649  ;;  %v642_v20 = vpop.permute.xlu0 %641 }
0x167a   :  { %v652_v22 = vadd.f32 %v650_v17, %v646_v16  ;;  %v644_v24 = vadd.f32 %v642_v20, %v1288_v8 }
0x167c   :  { %658 = vrot.lane.b32.xlu0 %v652_v22, %s1195_s23  ;;  %654 = vrot.lane.b32.xlu2 %v644_v24, %s1244_s16 }
0x16d6   :  { %v655_v26 = vpop.permute.xlu2 %654 }
0x16ee   :  { %v659_v28 = vpop.permute.xlu0 %658 }
0x16ef   :  { %v661_v29 = vsel %vm78_vm1, %v655_v26, %v659_v28 }
0x16f0   :  { %1137 = vtanh.f32 %v661_v29 }
0x16f6   :  { %v1641_v30 = vpop.eup %1137 }
0x16f7   :  { %v671_v31 = vmul.f32 %v1641_v30, %v1293_v12  ;;  %v663_v33 = vmul.f32 %v1641_v30, %v1285_v2  ;;  %v669_v36 = vmul.f32 %v1641_v30, %v1297_v14 }
0x16f9   :  { %673 = vrot.lane.b32.xlu2 %v671_v31, %s1196_s1  ;;  %665 = vrot.lane.b32.xlu1 %v663_v33, %s1245_s18  ;;  %v670_v38 = vadd.f32 %v669_v36, %v1301_v18 }
0x1753   :  { %v674_v39 = vpop.permute.xlu2 %673 }
0x1754   :  { %v676_v42 = vadd.f32 %v674_v39, %v670_v38 }
0x1756   :  { %682 = vrot.lane.b32.xlu1 %v676_v42, %s1195_s23 }
0x176b   :  { %v666_v43 = vpop.permute.xlu1 %665 }
0x176c   :  { %v668_v44 = vadd.f32 %v666_v43, %v1288_v8 }
0x176e   :  { %678 = vrot.lane.b32.xlu0 %v668_v44, %s1246_s19 }
0x17c8   :  { %v683_v45 = vpop.permute.xlu1 %682 }
0x17e0   :  { %v679_v46 = vpop.permute.xlu0 %678 }
0x17e1   :  { %v685_v47 = vsel %vm78_vm1, %v679_v46, %v683_v45 }
0x17e2   :  { %1139 = vtanh.f32 %v685_v47 }
0x17e8   :  { %v1654_v48 = vpop.eup %1139 }
0x17e9   :  { %v695_v54 = vmul.f32 %v1654_v48, %v1293_v12  ;;  %v687_v55 = vmul.f32 %v1654_v48, %v1285_v2  ;;  %v693_v59 = vmul.f32 %v1654_v48, %v1297_v14 }
0x17eb   :  { %697 = vrot.lane.b32.xlu0 %v695_v54, %s1196_s1  ;;  %689 = vrot.lane.b32.xlu2 %v687_v55, %s1247_s21  ;;  %v694_v60 = vadd.f32 %v693_v59, %v1301_v18 }
0x1845   :  { %v690_v56 = vpop.permute.xlu2 %689 }
0x1846   :  { %v692_v58 = vadd.f32 %v690_v56, %v1288_v8 }
0x1848   :  { %702 = vrot.lane.b32.xlu1 %v692_v58, %s1248_s22 }
0x185d   :  { %v698_v62 = vpop.permute.xlu0 %697 }
0x185e   :  { %v700_v63 = vadd.f32 %v698_v62, %v694_v60 }
0x1860   :  { %706 = vrot.lane.b32.xlu2 %v700_v63, %s1195_s23 }
0x18ba   :  { %v703_v1 = vpop.permute.xlu1 %702  ;;  %v707_v5 = vpop.permute.xlu2 %706 }
0x18bb   :  { %v709_v6 = vsel %vm78_vm1, %v703_v1, %v707_v5 }
0x18bc   :  { %1141 = vtanh.f32 %v709_v6 }
0x18c2   :  { %v1667_v9 = vpop.eup %1141 }
0x18c3   :  { %v719_v10 = vmul.f32 %v1667_v9, %v1293_v12  ;;  %v711_v15 = vmul.f32 %v1667_v9, %v1285_v2  ;;  %v717_v16 = vmul.f32 %v1667_v9, %v1297_v14 }
0x18c5   :  { %721 = vrot.lane.b32.xlu1 %v719_v10, %s1196_s1  ;;  %713 = vrot.lane.b32.xlu0 %v711_v15, %s1249_s25  ;;  %v718_v17 = vadd.f32 %v717_v16, %v1301_v18 }
0x1937   :  { %v722_v20 = vpop.permute.xlu1 %721  ;;  %v714_v22 = vpop.permute.xlu0 %713 }
0x1938   :  { %v724_v24 = vadd.f32 %v722_v20, %v718_v17  ;;  %v716_v26 = vadd.f32 %v714_v22, %v1288_v8 }
0x193a   :  { %730 = vrot.lane.b32.xlu0 %v724_v24, %s1195_s23  ;;  %726 = vrot.lane.b32.xlu2 %v716_v26, %s1250_s27 }
0x1994   :  { %v727_v28 = vpop.permute.xlu2 %726 }
0x19ac   :  { %v731_v29 = vpop.permute.xlu0 %730 }
0x19ad   :  { %v733_v31 = vsel %vm78_vm1, %v727_v28, %v731_v29 }
0x19ae   :  { %1143 = vtanh.f32 %v733_v31 }
0x19b4   :  { %v1680_v33 = vpop.eup %1143 }
0x19b5   :  { %v743_v36 = vmul.f32 %v1680_v33, %v1293_v12  ;;  %v735_v38 = vmul.f32 %v1680_v33, %v1285_v2  ;;  %v741_v39 = vmul.f32 %v1680_v33, %v1297_v14 }
0x19b7   :  { %745 = vrot.lane.b32.xlu2 %v743_v36, %s1196_s1  ;;  %737 = vrot.lane.b32.xlu1 %v735_v38, %s1251_s4  ;;  %v742_v42 = vadd.f32 %v741_v39, %v1301_v18 }
0x1a11   :  { %v746_v43 = vpop.permute.xlu2 %745 }
0x1a12   :  { %v748_v44 = vadd.f32 %v746_v43, %v742_v42 }
0x1a14   :  { %754 = vrot.lane.b32.xlu1 %v748_v44, %s1195_s23 }
0x1a29   :  { %v738_v45 = vpop.permute.xlu1 %737 }
0x1a2a   :  { %v740_v46 = vadd.f32 %v738_v45, %v1288_v8 }
0x1a2c   :  { %750 = vrot.lane.b32.xlu0 %v740_v46, %s1252_s8 }
0x1a86   :  { %v755_v47 = vpop.permute.xlu1 %754 }
0x1a9e   :  { %v751_v54 = vpop.permute.xlu0 %750 }
0x1a9f   :  { %v757_v55 = vsel %vm78_vm1, %v751_v54, %v755_v47 }
0x1aa0   :  { %1145 = vtanh.f32 %v757_v55 }
0x1aa6   :  { %v1146_v56 = vpop.eup %1145 }
0x1aa7   :  { %v767_v58 = vmul.f32 %v1146_v56, %v1293_v12  ;;  %v759_v59 = vmul.f32 %v1146_v56, %v1285_v2  ;;  %v765_v63 = vmul.f32 %v1146_v56, %v1297_v14 }
0x1aa9   :  { %769 = vrot.lane.b32.xlu0 %v767_v58, %s1196_s1  ;;  %761 = vrot.lane.b32.xlu2 %v759_v59, %s1253_s10  ;;  %v766_v1 = vadd.f32 %v765_v63, %v1301_v18 }
0x1b03   :  { %v762_v60 = vpop.permute.xlu2 %761 }
0x1b04   :  { %v764_v62 = vadd.f32 %v762_v60, %v1288_v8 }
0x1b06   :  { %774 = vrot.lane.b32.xlu1 %v764_v62, %s1254_s12 }
0x1b1b   :  { %v770_v5 = vpop.permute.xlu0 %769 }
0x1b1c   :  { %v772_v6 = vadd.f32 %v770_v5, %v766_v1 }
0x1b1e   :  { %778 = vrot.lane.b32.xlu2 %v772_v6, %s1195_s23 }
0x1b78   :  { %v775_v10 = vpop.permute.xlu1 %774  ;;  %v779_v15 = vpop.permute.xlu2 %778 }
0x1b79   :  { %v781_v16 = vsel %vm78_vm1, %v775_v10, %v779_v15 }
0x1b7a   :  { %1147 = vtanh.f32 %v781_v16 }
0x1b80   :  { %v1148_v17 = vpop.eup %1147 }
0x1b81   :  { %v791_v20 = vmul.f32 %v1148_v17, %v1293_v12  ;;  %v783_v22 = vmul.f32 %v1148_v17, %v1285_v2  ;;  %v789_v24 = vmul.f32 %v1148_v17, %v1297_v14 }
0x1b83   :  { %793 = vrot.lane.b32.xlu1 %v791_v20, %s1196_s1  ;;  %785 = vrot.lane.b32.xlu0 %v783_v22, %s1255_s14  ;;  %v790_v26 = vadd.f32 %v789_v24, %v1301_v18 }
0x1bf5   :  { %v794_v28 = vpop.permute.xlu1 %793  ;;  %v786_v29 = vpop.permute.xlu0 %785 }
0x1bf6   :  { %v796_v31 = vadd.f32 %v794_v28, %v790_v26  ;;  %v788_v36 = vadd.f32 %v786_v29, %v1288_v8 }
0x1bf8   :  { %802 = vrot.lane.b32.xlu0 %v796_v31, %s1195_s23  ;;  %798 = vrot.lane.b32.xlu2 %v788_v36, %s1256_s15 }
0x1c00   :  { %906 = vrot.lane.b32.xlu0 %v1537_v3, %s1196_s1  ;;  %817 = vrot.lane.b32.xlu2 %v1307_v25, %s1196_s1 }
0x1c08   :  { %918 = vrot.lane.b32.xlu0 %v1589_v13, %s1199_s30  ;;  %914 = vrot.lane.b32.xlu2 %v1576_v57, %s1197_s28 }
0x1c10   :  { %930 = vrot.lane.b32.xlu0 %v1628_v7, %s1205_s9  ;;  %926 = vrot.lane.b32.xlu2 %v1615_v52, %s1203_s7 }
0x1c18   :  { %942 = vrot.lane.b32.xlu0 %v1667_v9, %s1211_s17  ;;  %938 = vrot.lane.b32.xlu2 %v1654_v48, %s1209_s13 }
0x1c20   :  { %954 = vrot.lane.b32.xlu0 %v1148_v17, %s1217_s0  ;;  %950 = vrot.lane.b32.xlu2 %v1146_v56, %s1215_s20 }
0x1c28   :  { %821 = vrot.lane.b32.xlu0 %v1335_v49, %s1195_s23 }
0x1c30   :  { %833 = vrot.lane.b32.xlu0 %v1377_v27, %s1201_s5 }
0x1c38   :  { %845 = vrot.lane.b32.xlu0 %v1426_v4, %s1207_s11 }
0x1c40   :  { %857 = vrot.lane.b32.xlu0 %v1468_v50, %s1213_s3 }
0x1c48   :  { %869 = vrot.lane.b32.xlu0 %v1510_v34, %s1219_s24 }
0x1c52   :  { %v799_v2 = vpop.permute.xlu2 %798 }
0x1c6a   :  { %v803_v8 = vpop.permute.xlu0 %802 }
0x1c6b   :  { %v805_v25 = vsel %vm78_vm1, %v799_v2, %v803_v8 }
0x1c6c   :  { %1149 = vtanh.f32 %v805_v25 }
0x1c72   :  { %v1737_v3 = vpop.eup %1149  ;;  %v907_v49 = vpop.permute.xlu0 %906 }
0x1c73   :  { %v809_v27 = vmul.f32 %v1737_v3, %v1293_v12  ;;  %v818_v12 = vpop.permute.xlu2 %817 }
0x1c74   :  { %v876_v13 = vsel %vm78_vm1, %v818_v12, %v1321_v37  ;;  %v807_v37 = vmul.f32 %v1737_v3, %v1297_v14 }
0x1c75   :  { %811 = vrot.lane.b32.xlu1 %v809_v27, %s1196_s1 }
0x1c7a   :  { %v919_v4 = vpop.permute.xlu0 %918 }
0x1c7b   :  { %v915_v9 = vpop.permute.xlu2 %914 }
0x1c7d   :  { %910 = vrot.lane.b32.xlu1 %v1563_v41, %s1195_s23 }
0x1c82   :  { %v931_v50 = vpop.permute.xlu0 %930 }
0x1c85   :  { %922 = vrot.lane.b32.xlu1 %v1602_v32, %s1201_s5  ;;  %v808_v32 = vadd.f32 %v807_v37, %v1301_v18  ;;  %s1001_s5 = sshll.u32 %s1817_s2, 4  ;;  %s1002_s5 = int_to_ptr.hbm [resolvable:$true] %s1001_s5 }
0x1c8a   :  { %v943_v34 = vpop.permute.xlu0 %942 }
0x1c8d   :  { %934 = vrot.lane.b32.xlu1 %v1641_v30, %s1207_s11 }
0x1c92   :  { %v1748_v57 = vpop.permute.xlu0 %954 }
0x1c95   :  { %946 = vrot.lane.b32.xlu1 %v1680_v33, %s1213_s3  ;;  %v965_v33 = vsel %vm78_vm1, %v907_v49, %v1550_v23 }
0x1c9a   :  { %v822_v52 = vpop.permute.xlu0 %821 }
0x1c9b   :  { %v878_v41 = vsel %vm877_vm2, %v876_v13, %v822_v52 }
0x1c9d   :  { %958 = vrot.lane.b32.xlu1 %v1737_v3, %s1219_s24 }
0x1ca2   :  { %v834_v44 = vpop.permute.xlu0 %833 }
0x1ca5   :  { %825 = vrot.lane.b32.xlu1 %v1349_v61, %s1197_s28 }
0x1caa   :  { %v846_v55 = vpop.permute.xlu0 %845 }
0x1cad   :  { %837 = vrot.lane.b32.xlu1 %v1391_v40, %s1203_s7 }
0x1cb2   :  { %v858_v1 = vpop.permute.xlu0 %857 }
0x1cb5   :  { %849 = vrot.lane.b32.xlu1 %v1440_v21, %s1209_s13 }
0x1cba   :  { %v870_v16 = vpop.permute.xlu0 %869 }
0x1cbd   :  { %861 = vrot.lane.b32.xlu1 %v1482_v0, %s1215_s20 }
0x1cc5   :  { %873 = vrot.lane.b32.xlu1 %v1524_v51, %s1221_s26 }
0x1ce7   :  { %v812_v7 = vpop.permute.xlu1 %811 }
0x1ce8   :  { %v814_v30 = vadd.f32 %v812_v7, %v808_v32 }
0x1cea   :  { %1151 = vtanh.f32 %v814_v30 }
0x1cef   :  { %v911_v61 = vpop.permute.xlu1 %910 }
0x1cf0   :  { %v1152_v48 = vpop.eup %1151  ;;  %v966_v38 = vsel %vm877_vm2, %v965_v33, %v911_v61 }
0x1cf1   :  { %988 = vrot.lane.b32.xlu0 %v1152_v48, %s1195_s23  ;;  %962 = vrot.lane.b32.xlu2 %v1152_v48, %s1223_s29  ;;  %v967_v39 = vsel %vm879_vm3, %v966_v38, %v915_v9  ;;  %s1257_s23 = smov [#allocation6]  }
0x1cf2   :  { %s999_s1 = sshll.u32 %s1257_s23, 4  ;;  %s1000_s1 = int_to_ptr.vmem [resolvable:$true] %s999_s1 }
0x1cf7   :  { %v923_v40 = vpop.permute.xlu1 %922 }
0x1cf9   :  { %829 = vrot.lane.b32.xlu2 %v1363_v11, %s1199_s30  ;;  %v927_v11 = vpop.permute.xlu2 %926 }
0x1cff   :  { %v935_v21 = vpop.permute.xlu1 %934 }
0x1d01   :  { %841 = vrot.lane.b32.xlu2 %v1405_v53, %s1205_s9  ;;  %v968_v53 = vsel %vm881_vm4, %v967_v39, %v919_v4  ;;  %v939_v42 = vpop.permute.xlu2 %938 }
0x1d07   :  { %v947_v14 = vpop.permute.xlu1 %946 }
0x1d09   :  { %853 = vrot.lane.b32.xlu2 %v1454_v35, %s1211_s17  ;;  %v969_v35 = vsel %vm883_vm5, %v968_v53, %v923_v40  ;;  %v951_v46 = vpop.permute.xlu2 %950 }
0x1d0f   :  { %v959_v18 = vpop.permute.xlu1 %958 }
0x1d11   :  { %865 = vrot.lane.b32.xlu2 %v1496_v19, %s1217_s0  ;;  %v970_v19 = vsel %vm885_vm6, %v969_v35, %v927_v11 }
0x1d12   :  { %v971_v43 = vsel %vm887_vm7, %v970_v19, %v931_v50 }
0x1d13   :  { %v972_v23 = vsel %vm889_vm8, %v971_v43, %v935_v21 }
0x1d14   :  { %v973_v45 = vsel %vm891_vm9, %v972_v23, %v939_v42 }
0x1d15   :  { %v974_v47 = vsel %vm893_vm10, %v973_v45, %v943_v34 }
0x1d16   :  { %v975_v54 = vsel %vm895_vm11, %v974_v47, %v947_v14 }
0x1d17   :  { %v826_v0 = vpop.permute.xlu1 %825  ;;  %v976_v56 = vsel %vm897_vm12, %v975_v54, %v951_v46 }
0x1d18   :  { %v880_v51 = vsel %vm879_vm3, %v878_v41, %v826_v0  ;;  %v977_v58 = vsel %vm899_vm13, %v976_v56, %v1748_v57 }
0x1d19   :  { %v978_v59 = vsel %vm901_vm14, %v977_v58, %v959_v18 }
0x1d1f   :  { %v838_v63 = vpop.permute.xlu1 %837 }
0x1d27   :  { %v850_v10 = vpop.permute.xlu1 %849 }
0x1d2f   :  { %v862_v26 = vpop.permute.xlu1 %861 }
0x1d37   :  { %v874_v4 = vpop.permute.xlu1 %873 }
0x1d4b   :  { %v963_v60 = vpop.permute.xlu2 %962 }
0x1d4c   :  { %v979_v62 = vsel %vm903_vm15, %v978_v59, %v963_v60 }
0x1d4d   :  { %981 = vrot.lane.b32.xlu2 %v979_v62, %s1225_s6 }
0x1d53   :  { %v830_v5 = vpop.permute.xlu2 %829 }
0x1d54   :  { %v882_v6 = vsel %vm881_vm4, %v880_v51, %v830_v5 }
0x1d55   :  { %v884_v15 = vsel %vm883_vm5, %v882_v6, %v834_v44 }
0x1d56   :  { %v886_v20 = vsel %vm885_vm6, %v884_v15, %v838_v63 }
0x1d5b   :  { %v842_v17 = vpop.permute.xlu2 %841 }
0x1d5c   :  { %v888_v22 = vsel %vm887_vm7, %v886_v20, %v842_v17 }
0x1d5d   :  { %v890_v24 = vsel %vm889_vm8, %v888_v22, %v846_v55 }
0x1d5e   :  { %v892_v31 = vsel %vm891_vm9, %v890_v24, %v850_v10 }
0x1d63   :  { %v854_v28 = vpop.permute.xlu2 %853  ;;  %v989_v29 = vpop.permute.xlu0 %988 }
0x1d64   :  { %v991_v36 = vsel %vm78_vm1, %v1737_v3, %v989_v29  ;;  %v894_v2 = vsel %vm893_vm10, %v892_v31, %v854_v28  ;;  %vm984_vm1 = vcmask 130048  }
0x1d65   :  { %993 = vst.msk [vmem:[#allocation2] sm:$0x3] %vm31_vm0, %v991_v36  ;;  %v896_v8 = vsel %vm895_vm11, %v894_v2, %v858_v1  ;;  %vm986_vm0 = vcmask 254976  }
0x1d66   :  { %v898_v49 = vsel %vm897_vm12, %v896_v8, %v862_v26 }
0x1d6b   :  { %v866_v25 = vpop.permute.xlu2 %865 }
0x1d6c   :  { %v900_v27 = vsel %vm899_vm13, %v898_v49, %v866_v25 }
0x1d6d   :  { %v902_v50 = vsel %vm901_vm14, %v900_v27, %v870_v16 }
0x1d6e   :  { %v904_v34 = vsel %vm903_vm15, %v902_v50, %v874_v4 }
0x1da7   :  { %v982_v3 = vpop.permute.xlu2 %981 }
0x1da8   :  { %v985_v57 = vsel %vm984_vm1, %v904_v34, %v982_v3 }
0x1da9   :  { %987 = vst.msk [vmem:[#allocation6] sm:$0x3] %vm986_vm0, %v985_v57 }
0x1daa   :  { %1004 = dma.vmem_to_hbm [thread:$0]  %s1000_s1, 32, %s1002_s5, [#allocation4]  }
0x1dab   :  { %1191 = dma.done.wait [#allocation4], 32  }
0x1dac   :  { %1192 = vsyncadd [#allocation4], 4294967264 }
0x1dad   :  { %1013 = vsyncpa [#allocation4], 1 }
0x1dae   :  { %1014 = vsyncpa [#allocation5], 1 }

</bundles_post_ra>
